<compile_context>
chip_gen: v5e
topology: v5e:2x2
jax: 0.10.0
libtpu: 0.0.40
codegen_flags: <defaults>
</compile_context>

<pallas_src>
import functools

import jax
import jax.numpy as jnp
from jax.experimental import pallas as pl
from jax.experimental.pallas import tpu as pltpu


# --------------------------------------------------------------------------
# Pallas kernel: batched matrix (row/column) attention, one block, one store.
# --------------------------------------------------------------------------
def _matrix_attn_kernel(rq_ref, rk_ref, cq_ref, ck_ref, v_ref, o_ref, *, scale):
    # Lane axis q folds (n=batch*head, h, w) -> NQ = bn*H*W (lane-dense, >=128).
    #   rq: (kd, H, NQ)      rq[d, i, q=(n,h,w)] = rq[n, d, i, w]
    #   rk: (kd, NQ)         rk[d, q=(n,h,w)]    = rk[n, d, h, w]
    #   cq: (kd, W, NQ)      cq[d, j, q=(n,h,w)] = cq[n, d, h, j]
    #   ck: (kd, NQ)         ck[d, q=(n,h,w)]    = ck[n, d, h, w]
    #   v : (hd, H, W, NQ)   v [d, i, j, q]      = v [n, d, i, j]
    #   o : (hd, NQ)         o [d, q=(n,h,w)]    = out[n, d, h, w]
    rq = rq_ref[...]
    rk = rk_ref[...]
    cq = cq_ref[...]
    ck = ck_ref[...]
    v = v_ref[...]

    # Row attention: R[i, q] = softmax_i( scale * sum_d rq[n,d,i,w]*rk[n,d,h,w] )
    r_log = jnp.sum(rq * rk[:, None, :], axis=0) * scale          # (H, NQ)
    r_log = r_log - jnp.max(r_log, axis=0, keepdims=True)
    r_exp = jnp.exp(r_log)
    r_den = jnp.sum(r_exp, axis=0, keepdims=True)
    R = r_exp * pl.reciprocal(r_den, approx=True)                 # (H, NQ)

    # Column attention: C[j, q] = softmax_j( scale * sum_d cq[n,d,h,j]*ck[n,d,h,w] )
    c_log = jnp.sum(cq * ck[:, None, :], axis=0) * scale          # (W, NQ)
    c_log = c_log - jnp.max(c_log, axis=0, keepdims=True)
    c_exp = jnp.exp(c_log)
    c_den = jnp.sum(c_exp, axis=0, keepdims=True)
    C = c_exp * pl.reciprocal(c_den, approx=True)                 # (W, NQ)

    # out[d, q] = sum_i R[i, q] * ( sum_j v[d, i, j, q] * C[j, q] )
    M = jnp.sum(v * C[None, None, :, :], axis=2)                  # (hd, H, NQ)
    o_ref[...] = jnp.sum(M * R[None, :, :], axis=1)               # (hd, NQ)


def matrix_attention_core(rq, rk, cq, ck, v, scale):
    """rq/rk/cq/ck: (b, nh, kd, H, W), v: (b, nh, hd, H, W) -> (b, nh, hd, H, W)."""
    b, nh, kd, H, W = rq.shape
    hd = v.shape[2]
    bn = b * nh
    NQ = bn * H * W                                  # 16*5*5 = 400 lanes

    # Wrapper-side (plain JAX, tiny, XLA-fused) layout plumbing: fold the
    # batch*head and spatial axes into one lane-dense trailing axis and
    # materialise the broadcasts so the kernel needs no in-kernel relayout.
    rq_bn = rq.reshape(bn, kd, H, W)
    rk_bn = rk.reshape(bn, kd, H, W)
    cq_bn = cq.reshape(bn, kd, H, W)
    ck_bn = ck.reshape(bn, kd, H, W)
    v_bn = v.reshape(bn, hd, H, W)

    rq_e = jnp.broadcast_to(
        jnp.transpose(rq_bn, (1, 2, 0, 3))[:, :, :, None, :],     # (kd,Hi,bn,1,W)
        (kd, H, bn, H, W)).reshape(kd, H, NQ)
    rk_e = jnp.transpose(rk_bn, (1, 0, 2, 3)).reshape(kd, NQ)
    cq_e = jnp.broadcast_to(
        jnp.transpose(cq_bn, (1, 3, 0, 2))[:, :, :, :, None],     # (kd,Wj,bn,H,1)
        (kd, W, bn, H, W)).reshape(kd, W, NQ)
    ck_e = jnp.transpose(ck_bn, (1, 0, 2, 3)).reshape(kd, NQ)
    v_e = jnp.broadcast_to(
        jnp.transpose(v_bn, (1, 2, 3, 0))[:, :, :, :, None, None],  # (hd,Hi,Wj,bn,1,1)
        (hd, H, W, bn, H, W)).reshape(hd, H, W, NQ)

    out = pl.pallas_call(
        functools.partial(_matrix_attn_kernel, scale=float(scale)),
        out_shape=jax.ShapeDtypeStruct((hd, NQ), jnp.float32),
        grid=(1,),                                    # single step: no per-step overhead
        in_specs=[
            pl.BlockSpec((kd, H, NQ), lambda i: (0, 0, 0)),
            pl.BlockSpec((kd, NQ), lambda i: (0, 0)),
            pl.BlockSpec((kd, W, NQ), lambda i: (0, 0, 0)),
            pl.BlockSpec((kd, NQ), lambda i: (0, 0)),
            pl.BlockSpec((hd, H, W, NQ), lambda i: (0, 0, 0, 0)),
        ],
        out_specs=pl.BlockSpec((hd, NQ), lambda i: (0, 0)),
        compiler_params=pltpu.CompilerParams(
            dimension_semantics=("arbitrary",)),
    )(rq_e, rk_e, cq_e, ck_e, v_e)

    # (hd, bn*H*W) -> (b, nh, hd, H, W)
    out = out.reshape(hd, bn, H, W).transpose(1, 0, 2, 3)
    return out.reshape(b, nh, hd, H, W)


# --------------------------------------------------------------------------
# Plain-JAX glue layers (convs / BN / transposed conv) — per review, the
# conv paths use XLA's native conv (no XLA-side im2col + Pallas matmul).
# --------------------------------------------------------------------------
def conv2d(x, w, stride=1, pad=0, groups=1, lhs_dilation=None):
    return jax.lax.conv_general_dilated(
        x, w,
        window_strides=(stride, stride),
        padding=((pad, pad), (pad, pad)),
        lhs_dilation=lhs_dilation,
        feature_group_count=groups,
        dimension_numbers=("NCHW", "OIHW", "NCHW"))


def batchnorm(x, p, eps=1e-5):
    inv = p["gamma"] / jnp.sqrt(p["var"] + eps)
    return x * inv[None, :, None, None] + (p["beta"] - p["mean"] * inv)[None, :, None, None]


def conv_transpose_grouped(x, w_t, bias, k, s, p, groups):
    """Equivalent of nn.ConvTranspose2d(C_in, C_out, k, s, p, groups=groups)."""
    c_in, out_per_g = w_t.shape[0], w_t.shape[1]
    in_per_g = c_in // groups
    c_out = out_per_g * groups
    wf = w_t.reshape(groups, in_per_g, out_per_g, k, k)
    wf = jnp.transpose(wf, (0, 2, 1, 3, 4))                   # swap in/out per group
    wf = wf[:, :, :, ::-1, ::-1]                              # spatial flip
    wf = wf.reshape(c_out, in_per_g, k, k)
    y = conv2d(x, wf, stride=1, pad=k - 1 - p, groups=groups, lhs_dilation=(s, s))
    return y + bias[None, :, None, None]


# --------------------------------------------------------------------------
# Parameter init (deterministic, synthetic)
# --------------------------------------------------------------------------
def init_params(key, dim, hidden_dim, block_size, num_heads, attn_ratio):
    hd = hidden_dim // num_heads
    kd = int(hd * attn_ratio)
    h_total = hidden_dim + 4 * kd * num_heads
    ks = jax.random.split(key, 10)

    def w(k, shape, s=0.1):
        return (s * jax.random.normal(k, shape)).astype(jnp.float32)

    def bn(k, c):
        k1, k2, k3, k4 = jax.random.split(k, 4)
        return dict(gamma=1.0 + 0.1 * jax.random.normal(k1, (c,), jnp.float32),
                    beta=0.1 * jax.random.normal(k2, (c,), jnp.float32),
                    mean=0.1 * jax.random.normal(k3, (c,), jnp.float32),
                    var=1.0 + 0.1 * jnp.abs(jax.random.normal(k4, (c,), jnp.float32)))

    return dict(
        in_proj_w=w(ks[0], (hidden_dim, 1, block_size, block_size)),
        in_proj_bn=bn(ks[1], hidden_dim),
        rcv_w=w(ks[2], (h_total, hidden_dim, 3, 3)),
        rcv_bn=bn(ks[3], h_total),
        pe_w=w(ks[4], (hidden_dim, hidden_dim // dim, 3, 3)),
        pe_bn=bn(ks[5], hidden_dim),
        deconv_w=w(ks[6], (hidden_dim, dim // dim, block_size, block_size)),
        deconv_b=w(ks[7], (dim,)),
        out_w=w(ks[8], (dim, dim, 3, 3)),
        out_bn=bn(ks[9], dim),
    )


# --------------------------------------------------------------------------
# Full MatrixAttention forward
# --------------------------------------------------------------------------
def matrix_attention_forward(x, params, cfg):
    dim = cfg["dim"]
    hidden_dim = cfg["hidden_dim"]
    bs = cfg["block_size"]
    nh = cfg["num_heads"]
    hd = hidden_dim // nh
    kd = int(hd * cfg["attn_ratio"])
    scale = kd ** (-0.5)

    # in_proj: grouped strided conv + BN (act=False)
    y = conv2d(x, params["in_proj_w"], stride=bs, pad=bs // 2, groups=dim)
    y = batchnorm(y, params["in_proj_bn"])
    b, d, h, w = y.shape

    # rcv: 3x3 conv (hidden -> hidden + 4*nh*kd) with its BatchNorm folded
    # into the conv weights (inference-mode affine): one XLA conv, no extra
    # elementwise pass over z before the attention pallas_call.
    g = params["rcv_bn"]["gamma"] * jax.lax.rsqrt(params["rcv_bn"]["var"] + 1e-5)
    t = params["rcv_bn"]["beta"] - params["rcv_bn"]["mean"] * g
    z = conv2d(y, params["rcv_w"] * g[:, None, None, None], stride=1, pad=1)
    z = z + t[None, :, None, None]

    z5 = z.reshape(b, nh, 4 * kd + hd, h, w)
    rq = z5[:, :, 0 * kd:1 * kd]
    rk = z5[:, :, 1 * kd:2 * kd]
    cq = z5[:, :, 2 * kd:3 * kd]
    ck = z5[:, :, 3 * kd:4 * kd]
    v = z5[:, :, 4 * kd:]

    # Matrix (row/column) attention — single-block Pallas kernel
    attn = matrix_attention_core(rq, rk, cq, ck, v, scale)     # (b, nh, hd, h, w)
    xa = attn.reshape(b, d, h, w)

    # positional encoding branch: depthwise-grouped 3x3 conv + BN on v
    vv = v.reshape(b, d, h, w)
    pe = batchnorm(conv2d(vv, params["pe_w"], stride=1, pad=1, groups=dim),
                   params["pe_bn"])
    xa = xa + pe

    # out_proj: grouped ConvTranspose2d + (3x3 conv + BN)
    o = conv_transpose_grouped(xa, params["deconv_w"], params["deconv_b"],
                               k=bs, s=bs, p=bs // 2, groups=dim)
    o = conv2d(o, params["out_w"], stride=1, pad=1, groups=1)
    o = batchnorm(o, params["out_bn"])
    return o


# --------------------------------------------------------------------------
if __name__ == "__main__":
    dim, hidden_dim, block_size = 4, 32, 4
    num_heads, attn_ratio = 8, 0.5

    key = jax.random.PRNGKey(0)
    kx, kp = jax.random.split(key)
    x = jax.random.normal(kx, (2, dim, 16, 16), jnp.float32)
    params = init_params(kp, dim, hidden_dim, block_size, num_heads, attn_ratio)
    cfg = dict(dim=dim, hidden_dim=hidden_dim, block_size=block_size,
               num_heads=num_heads, attn_ratio=attn_ratio)

    fwd = jax.jit(functools.partial(matrix_attention_forward, cfg=cfg))
    out = fwd(x, params)
    out = jax.block_until_ready(out)

    assert out.shape == (2, dim, 16, 16), out.shape
    assert bool(jnp.all(jnp.isfinite(out)))
    print("KERNEL_OK")
</pallas_src>

<mosaic_0001>
module attributes {stable_mosaic.version = 11 : i64} {
  func.func @_matrix_attn_kernel(%arg0: i32, %arg1: memref<2x5x400xf32, #tpu.memory_space<vmem>>, %arg2: memref<2x400xf32, #tpu.memory_space<vmem>>, %arg3: memref<2x5x400xf32, #tpu.memory_space<vmem>>, %arg4: memref<2x400xf32, #tpu.memory_space<vmem>>, %arg5: memref<4x5x5x400xf32, #tpu.memory_space<vmem>>, %arg6: memref<4x400xf32, #tpu.memory_space<vmem>>) attributes {dimension_semantics = [#tpu.dimension_semantics<arbitrary>], iteration_bounds = array<i64: 1>, scalar_prefetch = 0 : i64, scratch_operands = 0 : i64, tpu.core_type = #tpu.core_type<tc>, window_params = [{pipeline_mode = #tpu.pipeline_mode<synchronous>, transform_indices = @transform_0, window_bounds = array<i64: 2, 5, 400>}, {pipeline_mode = #tpu.pipeline_mode<synchronous>, transform_indices = @transform_1, window_bounds = array<i64: 2, 400>}, {pipeline_mode = #tpu.pipeline_mode<synchronous>, transform_indices = @transform_2, window_bounds = array<i64: 2, 5, 400>}, {pipeline_mode = #tpu.pipeline_mode<synchronous>, transform_indices = @transform_3, window_bounds = array<i64: 2, 400>}, {pipeline_mode = #tpu.pipeline_mode<synchronous>, transform_indices = @transform_4, window_bounds = array<i64: 4, 5, 5, 400>}, {pipeline_mode = #tpu.pipeline_mode<synchronous>, transform_indices = @transform_5, window_bounds = array<i64: 4, 400>}]} {
    %c0 = arith.constant 0 : index
    %c0_0 = arith.constant 0 : index
    %c0_1 = arith.constant 0 : index
    %0 = vector.load %arg1[%c0, %c0_0, %c0_1] : memref<2x5x400xf32, #tpu.memory_space<vmem>>, vector<2x5x400xf32>
    %c0_2 = arith.constant 0 : index
    %c0_3 = arith.constant 0 : index
    %1 = vector.load %arg2[%c0_2, %c0_3] : memref<2x400xf32, #tpu.memory_space<vmem>>, vector<2x400xf32>
    %c0_4 = arith.constant 0 : index
    %c0_5 = arith.constant 0 : index
    %c0_6 = arith.constant 0 : index
    %2 = vector.load %arg3[%c0_4, %c0_5, %c0_6] : memref<2x5x400xf32, #tpu.memory_space<vmem>>, vector<2x5x400xf32>
    %c0_7 = arith.constant 0 : index
    %c0_8 = arith.constant 0 : index
    %3 = vector.load %arg4[%c0_7, %c0_8] : memref<2x400xf32, #tpu.memory_space<vmem>>, vector<2x400xf32>
    %c0_9 = arith.constant 0 : index
    %c0_10 = arith.constant 0 : index
    %c0_11 = arith.constant 0 : index
    %c0_12 = arith.constant 0 : index
    %4 = vector.load %arg5[%c0_9, %c0_10, %c0_11, %c0_12] : memref<4x5x5x400xf32, #tpu.memory_space<vmem>>, vector<4x5x5x400xf32>
    %5 = vector.shape_cast %1 : vector<2x400xf32> to vector<2x1x400xf32>
    %6 = vector.broadcast %5 : vector<2x1x400xf32> to vector<2x5x400xf32>
    %7 = arith.mulf %0, %6 : vector<2x5x400xf32>
    %cst = arith.constant dense<0.000000e+00> : vector<5x400xf32>
    %8 = vector.multi_reduction <add>, %7, %cst [0] : vector<2x5x400xf32> to vector<5x400xf32>
    %cst_13 = arith.constant 0.707106769 : f32
    %9 = vector.broadcast %cst_13 : f32 to vector<5x400xf32>
    %10 = arith.mulf %8, %9 : vector<5x400xf32>
    %cst_14 = arith.constant dense<0xFF800000> : vector<400xf32>
    %11 = vector.multi_reduction <maximumf>, %10, %cst_14 [0] : vector<5x400xf32> to vector<400xf32>
    %12 = vector.shape_cast %11 : vector<400xf32> to vector<1x400xf32>
    %13 = vector.broadcast %12 : vector<1x400xf32> to vector<5x400xf32>
    %14 = arith.subf %10, %13 : vector<5x400xf32>
    %15 = math.exp %14 : vector<5x400xf32>
    %cst_15 = arith.constant dense<0.000000e+00> : vector<400xf32>
    %16 = vector.multi_reduction <add>, %15, %cst_15 [0] : vector<5x400xf32> to vector<400xf32>
    %17 = vector.shape_cast %16 : vector<400xf32> to vector<1x400xf32>
    %18 = tpu.reciprocal %17 {approx = true} : vector<1x400xf32> -> vector<1x400xf32>
    %19 = vector.broadcast %18 : vector<1x400xf32> to vector<5x400xf32>
    %20 = arith.mulf %15, %19 : vector<5x400xf32>
    %21 = vector.shape_cast %3 : vector<2x400xf32> to vector<2x1x400xf32>
    %22 = vector.broadcast %21 : vector<2x1x400xf32> to vector<2x5x400xf32>
    %23 = arith.mulf %2, %22 : vector<2x5x400xf32>
    %cst_16 = arith.constant dense<0.000000e+00> : vector<5x400xf32>
    %24 = vector.multi_reduction <add>, %23, %cst_16 [0] : vector<2x5x400xf32> to vector<5x400xf32>
    %cst_17 = arith.constant 0.707106769 : f32
    %25 = vector.broadcast %cst_17 : f32 to vector<5x400xf32>
    %26 = arith.mulf %24, %25 : vector<5x400xf32>
    %cst_18 = arith.constant dense<0xFF800000> : vector<400xf32>
    %27 = vector.multi_reduction <maximumf>, %26, %cst_18 [0] : vector<5x400xf32> to vector<400xf32>
    %28 = vector.shape_cast %27 : vector<400xf32> to vector<1x400xf32>
    %29 = vector.broadcast %28 : vector<1x400xf32> to vector<5x400xf32>
    %30 = arith.subf %26, %29 : vector<5x400xf32>
    %31 = math.exp %30 : vector<5x400xf32>
    %cst_19 = arith.constant dense<0.000000e+00> : vector<400xf32>
    %32 = vector.multi_reduction <add>, %31, %cst_19 [0] : vector<5x400xf32> to vector<400xf32>
    %33 = vector.shape_cast %32 : vector<400xf32> to vector<1x400xf32>
    %34 = tpu.reciprocal %33 {approx = true} : vector<1x400xf32> -> vector<1x400xf32>
    %35 = vector.broadcast %34 : vector<1x400xf32> to vector<5x400xf32>
    %36 = arith.mulf %31, %35 : vector<5x400xf32>
    %37 = vector.shape_cast %36 : vector<5x400xf32> to vector<1x1x5x400xf32>
    %38 = vector.broadcast %37 : vector<1x1x5x400xf32> to vector<4x5x5x400xf32>
    %39 = arith.mulf %4, %38 : vector<4x5x5x400xf32>
    %cst_20 = arith.constant dense<0.000000e+00> : vector<4x5x400xf32>
    %40 = vector.multi_reduction <add>, %39, %cst_20 [2] : vector<4x5x5x400xf32> to vector<4x5x400xf32>
    %41 = vector.shape_cast %20 : vector<5x400xf32> to vector<1x5x400xf32>
    %42 = vector.broadcast %41 : vector<1x5x400xf32> to vector<4x5x400xf32>
    %43 = arith.mulf %40, %42 : vector<4x5x400xf32>
    %cst_21 = arith.constant dense<0.000000e+00> : vector<4x400xf32>
    %44 = vector.multi_reduction <add>, %43, %cst_21 [1] : vector<4x5x400xf32> to vector<4x400xf32>
    %c0_22 = arith.constant 0 : index
    %c0_23 = arith.constant 0 : index
    %45 = vector.load %arg6[%c0_22, %c0_23] : memref<4x400xf32, #tpu.memory_space<vmem>>, vector<4x400xf32>
    tpu.vector_store %arg6[%c0_22, %c0_23], %44 {strides = array<i32>} : memref<4x400xf32, #tpu.memory_space<vmem>>, vector<4x400xf32>,
    return
  }
  func.func @transform_0(%arg0: i32) -> (i32, i32, i32) {
    %c0_i32 = arith.constant 0 : i32
    %c0_i32_0 = arith.constant 0 : i32
    %c0_i32_1 = arith.constant 0 : i32
    %c0_i32_2 = arith.constant 0 : i32
    return %c0_i32, %c0_i32_0, %c0_i32_1 : i32, i32, i32
  }
  func.func @transform_1(%arg0: i32) -> (i32, i32) {
    %c0_i32 = arith.constant 0 : i32
    %c0_i32_0 = arith.constant 0 : i32
    %c0_i32_1 = arith.constant 0 : i32
    return %c0_i32, %c0_i32_0 : i32, i32
  }
  func.func @transform_2(%arg0: i32) -> (i32, i32, i32) {
    %c0_i32 = arith.constant 0 : i32
    %c0_i32_0 = arith.constant 0 : i32
    %c0_i32_1 = arith.constant 0 : i32
    %c0_i32_2 = arith.constant 0 : i32
    return %c0_i32, %c0_i32_0, %c0_i32_1 : i32, i32, i32
  }
  func.func @transform_3(%arg0: i32) -> (i32, i32) {
    %c0_i32 = arith.constant 0 : i32
    %c0_i32_0 = arith.constant 0 : i32
    %c0_i32_1 = arith.constant 0 : i32
    return %c0_i32, %c0_i32_0 : i32, i32
  }
  func.func @transform_4(%arg0: i32) -> (i32, i32, i32, i32) {
    %c0_i32 = arith.constant 0 : i32
    %c0_i32_0 = arith.constant 0 : i32
    %c0_i32_1 = arith.constant 0 : i32
    %c0_i32_2 = arith.constant 0 : i32
    %c0_i32_3 = arith.constant 0 : i32
    return %c0_i32, %c0_i32_0, %c0_i32_1, %c0_i32_2 : i32, i32, i32, i32
  }
  func.func @transform_5(%arg0: i32) -> (i32, i32) {
    %c0_i32 = arith.constant 0 : i32
    %c0_i32_0 = arith.constant 0 : i32
    %c0_i32_1 = arith.constant 0 : i32
    return %c0_i32, %c0_i32_0 : i32, i32
  }
}

</mosaic_0001>

<bundles_post_ra>
// kernel: matrix_attention_forward.1
= control target key start
LH: loop header
LB: loop body
LE: loop exit
PB: predicated region body
PF: predicated region fallthrough
CT: control target
= control target key end

     0   :  { %vm122_vm0 = vcmask 1040384   ;;  %vm124_vm1 = vcmask 1042434   ;;  %vm126_vm2 = vcmask 1041408   ;;  %vm128_vm3 = vcmask 1041409   ;;  %s3191_s1 = inlined_call_operand.vmem [shape: f32[2,400], index: 1, kind: input, shape index: {}]   ;;  %s3192_s3 = inlined_call_operand.vmem [shape: f32[2,400], index: 3, kind: input, shape index: {}]   ;;  %s3193_s0 = inlined_call_operand.vmem [shape: f32[2,5,400], index: 0, kind: input, shape index: {}]   ;;  %s3194_s2 = inlined_call_operand.vmem [shape: f32[2,5,400], index: 2, kind: input, shape index: {}]   ;;  %s3195_s4 = inlined_call_operand.vmem [shape: f32[4,5,5,400], index: 4, kind: input, shape index: {}]   ;;  %s3196_s5 = inlined_call_operand.vmem [shape: f32[4,400], index: 5, kind: output, shape index: {}]  }
   0x1   :  { %v28_v0 = vld [vmem:[%s3191_s1] sm:$0xff]  ;;  %vm130_vm4 = vcmask 1043459   ;;  %vm132_vm5 = vcmask 1042433   ;;  %vm159_vm6 = vcmask 1044480   ;;  %v21_v9 = vld [vmem:[%s3193_s0 + $0x8] sm:$0x1f] }
   0x2   :  { %v119_v1 = vrot.slane %v28_v0, 1  ;;  %v37_v2 = vld [vmem:[%s3192_s3] sm:$0xff]  ;;  %v120_v3 = vrot.slane %v28_v0, 2  ;;  %v121_v4 = vrot.slane %v28_v0, 3  ;;  %v22_v10 = vld [vmem:[%s3193_s0 + $0x10] sm:$0x1f] }
   0x3   :  { %v254_v7 = vrot.slane %v37_v2, 1  ;;  %v20_v8 = vld [vmem:[%s3193_s0] sm:$0x1f]  ;;  %v255_v13 = vrot.slane %v37_v2, 2  ;;  %v256_v14 = vrot.slane %v37_v2, 3  ;;  %vm169_vm7 = vcmask 126976  }
   0x4   :  { %v123_v5 = vsel %vm122_vm0, %v28_v0, %v119_v1  ;;  %v129_v6 = vsel %vm128_vm3, %v28_v0, %v119_v1  ;;  %v125_v11 = vsel %vm124_vm1, %v120_v3, %v121_v4  ;;  %v131_v12 = vsel %vm130_vm4, %v120_v3, %v121_v4  ;;  %v23_v15 = vld [vmem:[%s3193_s0 + $0x18] sm:$0x1f]  ;;  %v24_v16 = vld [vmem:[%s3193_s0 + $0x20] sm:$0x1f]  ;;  %v25_v20 = vld [vmem:[%s3193_s0 + $0x28] sm:$0x1f] }
   0x5   :  { %v127_v17 = vsel %vm126_vm2, %v123_v5, %v125_v11  ;;  %v133_v18 = vsel %vm132_vm5, %v129_v6, %v131_v12  ;;  %v257_v19 = vsel %vm122_vm0, %v37_v2, %v254_v7  ;;  %v26_v25 = vld [vmem:[%s3193_s0 + $0x30] sm:$0x1f]  ;;  %v27_v26 = vld [vmem:[%s3193_s0 + $0x38] sm:$0x1f]  ;;  %v258_v28 = vsel %vm124_vm1, %v255_v13, %v256_v14  ;;  %v29_v60 = vld [vmem:[%s3194_s2] sm:$0x1f] }
   0x6   :  { %v134_v21 = vrot.slane %v133_v18, 1  ;;  %v135_v22 = vperm.slane %v127_v17, 0  ;;  %v136_v23 = vperm.slane %v127_v17, 1  ;;  %v137_v24 = vperm.slane %v127_v17, 2  ;;  %v30_v1 = vld [vmem:[%s3194_s2 + $0x8] sm:$0x1f] }
   0x7   :  { %v138_v27 = vperm.slane %v127_v17, 3  ;;  %v260_v29 = vsel %vm128_vm3, %v37_v2, %v254_v7  ;;  %v261_v30 = vsel %vm130_vm4, %v255_v13, %v256_v14  ;;  %v259_v55 = vsel %vm126_vm2, %v257_v19, %v258_v28  ;;  %v31_v6 = vld [vmem:[%s3194_s2 + $0x10] sm:$0x1f]  ;;  %v32_v11 = vld [vmem:[%s3194_s2 + $0x18] sm:$0x1f] }
   0x8   :  { %v139_v31 = vperm.slane %v134_v21, 0  ;;  %v140_v32 = vperm.slane %v134_v21, 1  ;;  %v141_v33 = vperm.slane %v134_v21, 2  ;;  %v142_v34 = vperm.slane %v134_v21, 3  ;;  %v34_v17 = vld [vmem:[%s3194_s2 + $0x28] sm:$0x1f] }
   0x9   :  { %v151_v35 = vmul.f32 %v135_v22, %v20_v8  ;;  %v152_v36 = vmul.f32 %v136_v23, %v21_v9  ;;  %v153_v37 = vmul.f32 %v137_v24, %v22_v10  ;;  %v154_v38 = vmul.f32 %v138_v27, %v23_v15  ;;  %v35_v22 = vld [vmem:[%s3194_s2 + $0x30] sm:$0x1f]  ;;  %v36_v27 = vld [vmem:[%s3194_s2 + $0x38] sm:$0x1f] }
   0xa   :  { %v155_v39 = vmul.f32 %v139_v31, %v24_v16  ;;  %v156_v40 = vmul.f32 %v140_v32, %v25_v20  ;;  %v157_v41 = vmul.f32 %v141_v33, %v26_v25  ;;  %v158_v42 = vmul.f32 %v142_v34, %v27_v26  ;;  %v33_v16 = vld [vmem:[%s3194_s2 + $0x20] sm:$0x1f] }
   0xb   :  { %v160_v43 = vsel %vm159_vm6, %v151_v35, 0.0  ;;  %v163_v44 = vsel %vm159_vm6, %v152_v36, 0.0  ;;  %v166_v45 = vsel %vm159_vm6, %v153_v37, 0.0  ;;  %v170_v46 = vsel %vm169_vm7, %v154_v38, 0.0 }
   0xc   :  { %v161_v47 = vsel %vm159_vm6, %v155_v39, 0.0  ;;  %v164_v48 = vsel %vm159_vm6, %v156_v40, 0.0  ;;  %v167_v49 = vsel %vm159_vm6, %v157_v41, 0.0  ;;  %v171_v50 = vsel %vm169_vm7, %v158_v42, 0.0 }
   0xd   :  { %v162_v51 = vadd.f32 %v161_v47, %v160_v43  ;;  %v165_v52 = vadd.f32 %v164_v48, %v163_v44  ;;  %v168_v53 = vadd.f32 %v167_v49, %v166_v45  ;;  %v172_v54 = vadd.f32 %v171_v50, %v170_v46 }
   0xe   :  { %v262_v56 = vsel %vm132_vm5, %v260_v29, %v261_v30  ;;  %v264_v63 = vperm.slane %v259_v55, 0  ;;  %v265_v0 = vperm.slane %v259_v55, 1  ;;  %v266_v5 = vperm.slane %v259_v55, 2 }
   0xf   :  { %v1653_v57 = vmul.f32 0.70710677, %v162_v51  ;;  %v1655_v58 = vmul.f32 0.70710677, %v165_v52  ;;  %v1657_v59 = vmul.f32 0.70710677, %v168_v53 }
  0x10   :  { %v1662_v61 = vmul.f32 0.70710677, %v172_v54  ;;  %v263_v62 = vrot.slane %v262_v56, 1  ;;  %v267_v13 = vperm.slane %v259_v55, 3  ;;  %v280_v25 = vmul.f32 %v264_v63, %v29_v60 }
  0x11   :  { %v177_v2 = vsel %vm159_vm6, %v1653_v57, -inf  ;;  %v184_v3 = vsel %vm159_vm6, %v1655_v58, -inf  ;;  %v191_v4 = vsel %vm159_vm6, %v1657_v59, -inf  ;;  %v281_v26 = vmul.f32 %v265_v0, %v30_v1 }
  0x12   :  { %v178_v7 = vrot.slane %v177_v2, 4  ;;  %v185_v8 = vrot.slane %v184_v3, 4  ;;  %v192_v9 = vrot.slane %v191_v4, 4  ;;  %v198_v10 = vsel %vm169_vm7, %v1662_v61, -inf }
  0x13   :  { %v199_v12 = vrot.slane %v198_v10, 4  ;;  %v268_v14 = vperm.slane %v263_v62, 0  ;;  %v269_v15 = vperm.slane %v263_v62, 1  ;;  %v270_v21 = vperm.slane %v263_v62, 2 }
  0x14   :  { %v179_v18 = vmax.f32 %v177_v2, %v178_v7  ;;  %v186_v19 = vmax.f32 %v184_v3, %v185_v8  ;;  %v193_v20 = vmax.f32 %v191_v4, %v192_v9  ;;  %v271_v24 = vperm.slane %v263_v62, 3 }
  0x15   :  { %v200_v23 = vmax.f32 %v198_v10, %v199_v12  ;;  %v282_v31 = vmul.f32 %v266_v5, %v31_v6  ;;  %v283_v33 = vmul.f32 %v267_v13, %v32_v11  ;;  %v284_v34 = vmul.f32 %v268_v14, %v33_v16 }
  0x16   :  { %v180_v28 = vrot.slane %v179_v18, 2  ;;  %v187_v29 = vrot.slane %v186_v19, 2  ;;  %v194_v30 = vrot.slane %v193_v20, 2  ;;  %v285_v35 = vmul.f32 %v269_v15, %v34_v17 }
  0x17   :  { %v201_v32 = vrot.slane %v200_v23, 2  ;;  %v286_v39 = vmul.f32 %v270_v21, %v35_v22  ;;  %v287_v41 = vmul.f32 %v271_v24, %v36_v27  ;;  %v288_v42 = vsel %vm159_vm6, %v280_v25, 0.0 }
  0x18   :  { %v181_v36 = vmax.f32 %v179_v18, %v180_v28  ;;  %v188_v37 = vmax.f32 %v186_v19, %v187_v29  ;;  %v195_v38 = vmax.f32 %v193_v20, %v194_v30  ;;  %v289_v43 = vsel %vm159_vm6, %v284_v34, 0.0 }
  0x19   :  { %v202_v40 = vmax.f32 %v200_v23, %v201_v32  ;;  %v290_v47 = vadd.f32 %v289_v43, %v288_v42  ;;  %v291_v49 = vsel %vm159_vm6, %v281_v26, 0.0  ;;  %v292_v50 = vsel %vm159_vm6, %v285_v35, 0.0 }
  0x1a   :  { %v182_v44 = vrot.slane %v181_v36, 1  ;;  %v189_v45 = vrot.slane %v188_v37, 1  ;;  %v196_v46 = vrot.slane %v195_v38, 1  ;;  %v294_v51 = vsel %vm159_vm6, %v282_v31, 0.0 }
  0x1b   :  { %v203_v48 = vrot.slane %v202_v40, 1  ;;  %v293_v55 = vadd.f32 %v292_v50, %v291_v49  ;;  %v295_v60 = vsel %vm159_vm6, %v286_v39, 0.0  ;;  %v297_v62 = vsel %vm169_vm7, %v283_v33, 0.0 }
  0x1c   :  { %v183_v52 = vmax.f32 %v181_v36, %v182_v44  ;;  %v190_v53 = vmax.f32 %v188_v37, %v189_v45  ;;  %v197_v54 = vmax.f32 %v195_v38, %v196_v46  ;;  %v298_v63 = vsel %vm169_vm7, %v287_v41, 0.0 }
  0x1d   :  { %v204_v56 = vmax.f32 %v202_v40, %v203_v48  ;;  %v296_v3 = vadd.f32 %v295_v60, %v294_v51  ;;  %v299_v5 = vadd.f32 %v298_v63, %v297_v62  ;;  %v300_v6 = vmul.f32 0.70710677, %v290_v47 }
  0x1e   :  { %v205_v0 = vsub.f32 %v1653_v57, %v183_v52  ;;  %v206_v1 = vsub.f32 %v1655_v58, %v190_v53  ;;  %v207_v2 = vsub.f32 %v1657_v59, %v197_v54  ;;  %v301_v7 = vmul.f32 0.70710677, %v293_v55 }
  0x1f   :  { %v208_v4 = vsub.f32 %v1662_v61, %v204_v56  ;;  %v302_v12 = vmul.f32 0.70710677, %v296_v3  ;;  %v1705_v13 = vmul.f32 0.70710677, %v299_v5  ;;  %v304_v57 = vsel %vm159_vm6, %v300_v6, -inf }
  0x20   :  { %v209_v8 = vmul.f32 1.442695, %v205_v0  ;;  %v211_v9 = vmul.f32 1.442695, %v206_v1  ;;  %v213_v10 = vmul.f32 1.442695, %v207_v2 }
  0x21   :  { %v215_v11 = vmul.f32 1.442695, %v208_v4  ;;  %v311_v58 = vsel %vm159_vm6, %v301_v7, -inf  ;;  %v305_v59 = vrot.slane %v304_v57, 4  ;;  %v318_v61 = vsel %vm159_vm6, %v302_v12, -inf }
  0x22   :  { %1541 = vpow2.f32 %v209_v8  ;;  %v312_v14 = vrot.slane %v311_v58, 4  ;;  %v319_v15 = vrot.slane %v318_v61, 4  ;;  %v325_v16 = vsel %vm169_vm7, %v1705_v13, -inf }
  0x23   :  { %1543 = vpow2.f32 %v211_v9  ;;  %v306_v17 = vmax.f32 %v304_v57, %v305_v59  ;;  %v326_v19 = vrot.slane %v325_v16, 4  ;;  %vm1227_vm8 = vcmask 1044484  }
  0x24   :  { %1545 = vpow2.f32 %v213_v10  ;;  %v313_v18 = vmax.f32 %v311_v58, %v312_v14  ;;  %v320_v20 = vmax.f32 %v318_v61, %v319_v15  ;;  %vm1501_vm9 = vcmask 1043456  }
  0x25   :  { %1547 = vpow2.f32 %v215_v11  ;;  %v307_v21 = vrot.slane %v306_v17, 2  ;;  %v327_v23 = vmax.f32 %v325_v16, %v326_v19  ;;  %vm1512_vm10 = vcmask 1045509  }
  0x26   :  { %v314_v22 = vrot.slane %v313_v18, 2  ;;  %v321_v25 = vrot.slane %v320_v20, 2  ;;  %vm1516_vm11 = vcmask 1046534   ;;  %vm1520_vm12 = vcmask 1047559  }
  0x27   :  { %v308_v28 = vmax.f32 %v306_v17, %v307_v21  ;;  %v328_v33 = vrot.slane %v327_v23, 2  ;;  %vm1534_vm13 = vcmask 130052  }
  0x28   :  { %v1712_v24 = vpop.eup %1541  ;;  %v315_v29 = vmax.f32 %v313_v18, %v314_v22  ;;  %v322_v32 = vmax.f32 %v320_v20, %v321_v25  ;;  %vm1535_vm14 = vmor %vm1534_vm13, %vm1501_vm9 }
  0x29   :  { %v1714_v26 = vpop.eup %1543  ;;  %v217_v27 = vsel %vm159_vm6, %v1712_v24, 0.0  ;;  %v309_v37 = vrot.slane %v308_v28, 1  ;;  %v329_v47 = vmax.f32 %v327_v23, %v328_v33 }
  0x2a   :  { %v1718_v30 = vpop.eup %1545  ;;  %v224_v31 = vsel %vm159_vm6, %v1714_v26, 0.0  ;;  %v218_v35 = vrot.slane %v217_v27, 4  ;;  %v316_v38 = vrot.slane %v315_v29, 1  ;;  %v323_v41 = vrot.slane %v322_v32, 1 }
  0x2b   :  { %v1722_v34 = vpop.eup %1547  ;;  %v231_v36 = vsel %vm159_vm6, %v1718_v30, 0.0  ;;  %v225_v39 = vrot.slane %v224_v31, 4  ;;  %v310_v43 = vmax.f32 %v308_v28, %v309_v37  ;;  %v330_v52 = vrot.slane %v329_v47, 1 }
  0x2c   :  { %v238_v40 = vsel %vm169_vm7, %v1722_v34, 0.0  ;;  %v232_v42 = vrot.slane %v231_v36, 4  ;;  %v317_v44 = vmax.f32 %v315_v29, %v316_v38  ;;  %v324_v46 = vmax.f32 %v322_v32, %v323_v41 }
  0x2d   :  { %v239_v45 = vrot.slane %v238_v40, 4  ;;  %v219_v48 = vadd.f32 %v218_v35, %v217_v27  ;;  %v332_v49 = vsub.f32 %v300_v6, %v310_v43  ;;  %v226_v51 = vadd.f32 %v225_v39, %v224_v31 }
  0x2e   :  { %v333_v50 = vsub.f32 %v301_v7, %v317_v44  ;;  %v334_v53 = vsub.f32 %v302_v12, %v324_v46  ;;  %v233_v54 = vadd.f32 %v232_v42, %v231_v36  ;;  %v331_v62 = vmax.f32 %v329_v47, %v330_v52  ;;  %v38_v52 = vld [vmem:[%s3195_s4] sm:$0x1f] }
  0x2f   :  { %v336_v55 = vmul.f32 1.442695, %v332_v49  ;;  %v240_v60 = vadd.f32 %v239_v45, %v238_v40  ;;  %v220_v0 = vrot.slane %v219_v48, 2  ;;  %v227_v1 = vrot.slane %v226_v51, 2 }
  0x30   :  { %v338_v56 = vmul.f32 1.442695, %v333_v50  ;;  %v340_v63 = vmul.f32 1.442695, %v334_v53  ;;  %v335_v2 = vsub.f32 %v1705_v13, %v331_v62  ;;  %v234_v3 = vrot.slane %v233_v54, 2 }
  0x31   :  { %1549 = vpow2.f32 %v336_v55  ;;  %v241_v4 = vrot.slane %v240_v60, 2  ;;  %v221_v6 = vadd.f32 %v220_v0, %v219_v48  ;;  %v228_v7 = vadd.f32 %v227_v1, %v226_v51  ;;  %v42_v55 = vld [vmem:[%s3195_s4 + $0x20] sm:$0x1f]  ;;  %v44_v0 = vld [vmem:[%s3195_s4 + $0x30] sm:$0x1f] }
  0x32   :  { %1551 = vpow2.f32 %v338_v56  ;;  %v342_v5 = vmul.f32 1.442695, %v335_v2  ;;  %v235_v9 = vadd.f32 %v234_v3, %v233_v54  ;;  %v39_v54 = vld [vmem:[%s3195_s4 + $0x8] sm:$0x1f]  ;;  %v46_v1 = vld [vmem:[%s3195_s4 + $0x40] sm:$0x1f] }
  0x33   :  { %1553 = vpow2.f32 %v340_v63  ;;  %v242_v11 = vadd.f32 %v241_v4, %v240_v60  ;;  %v222_v13 = vrot.slane %v221_v6, 1  ;;  %v229_v14 = vrot.slane %v228_v7, 1  ;;  %v43_v56 = vld [vmem:[%s3195_s4 + $0x28] sm:$0x1f]  ;;  %v40_v63 = vld [vmem:[%s3195_s4 + $0x10] sm:$0x1f] }
  0x34   :  { %1555 = vpow2.f32 %v342_v5  ;;  %v236_v16 = vrot.slane %v235_v9, 1  ;;  %v47_v2 = vld [vmem:[%s3195_s4 + $0x48] sm:$0x1f]  ;;  %v48_v3 = vld [vmem:[%s3195_s4 + $0x50] sm:$0x1f] }
  0x35   :  { %v243_v19 = vrot.slane %v242_v11, 1  ;;  %v223_v21 = vadd.f32 %v222_v13, %v221_v6  ;;  %v230_v27 = vadd.f32 %v229_v14, %v228_v7  ;;  %v50_v5 = vld [vmem:[%s3195_s4 + $0x60] sm:$0x1f]  ;;  %v51_v6 = vld [vmem:[%s3195_s4 + $0x68] sm:$0x1f] }
  0x36   :  { %v237_v29 = vadd.f32 %v236_v16, %v235_v9  ;;  %v52_v7 = vld [vmem:[%s3195_s4 + $0x70] sm:$0x1f]  ;;  %v54_v13 = vld [vmem:[%s3195_s4 + $0x80] sm:$0x1f]  ;;  %v59_v16 = vld [vmem:[%s3195_s4 + $0xa8] sm:$0x1f] }
  0x37   :  { %v1729_v8 = vpop.eup %1549  ;;  %v244_v35 = vadd.f32 %v243_v19, %v242_v11  ;;  %1557 = vrcp.f32 %v223_v21  ;;  %v63_v19 = vld [vmem:[%s3195_s4 + $0xc8] sm:$0x1f] }
  0x38   :  { %v1731_v10 = vpop.eup %1551  ;;  %v344_v12 = vsel %vm159_vm6, %v1729_v8, 0.0  ;;  %1559 = vrcp.f32 %v230_v27  ;;  %v41_v27 = vld [vmem:[%s3195_s4 + $0x18] sm:$0x1f] }
  0x39   :  { %v1735_v57 = vpop.eup %1553  ;;  %v345_v58 = vrot.slane %v344_v12, 4  ;;  %v351_v59 = vsel %vm159_vm6, %v1731_v10, 0.0  ;;  %1561 = vrcp.f32 %v237_v29  ;;  %v49_v29 = vld [vmem:[%s3195_s4 + $0x58] sm:$0x1f] }
  0x3a   :  { %v352_v61 = vrot.slane %v351_v59, 4  ;;  %v358_v15 = vsel %vm159_vm6, %v1735_v57, 0.0  ;;  %v1741_v25 = vpop.eup %1555  ;;  %1563 = vrcp.f32 %v244_v35  ;;  %v68_v35 = vld [vmem:[%s3195_s4 + $0xf0] sm:$0x1f] }
  0x3b   :  { %v346_v17 = vadd.f32 %v345_v58, %v344_v12  ;;  %v359_v18 = vrot.slane %v358_v15, 4  ;;  %v365_v33 = vsel %vm169_vm7, %v1741_v25, 0.0  ;;  %v55_v58 = vld [vmem:[%s3195_s4 + $0x88] sm:$0x1f] }
  0x3c   :  { %v353_v20 = vadd.f32 %v352_v61, %v351_v59  ;;  %v366_v37 = vrot.slane %v365_v33, 4  ;;  %v56_v59 = vld [vmem:[%s3195_s4 + $0x90] sm:$0x1f] }
  0x3d   :  { %v347_v22 = vrot.slane %v346_v17, 2  ;;  %v360_v23 = vadd.f32 %v359_v18, %v358_v15  ;;  %v1558_v48 = vpop.eup %1557  ;;  %v58_v15 = vld [vmem:[%s3195_s4 + $0xa0] sm:$0x1f] }
  0x3e   :  { %v354_v28 = vrot.slane %v353_v20, 2  ;;  %v367_v41 = vadd.f32 %v366_v37, %v365_v33  ;;  %v1560_v49 = vpop.eup %1559  ;;  %v1782_v9 = vmul.f32 %v1558_v48, %v1712_v24  ;;  %v62_v18 = vld [vmem:[%s3195_s4 + $0xc0] sm:$0x1f]  ;;  %v67_v33 = vld [vmem:[%s3195_s4 + $0xe8] sm:$0x1f] }
  0x3f   :  { %v348_v31 = vadd.f32 %v347_v22, %v346_v17  ;;  %v361_v32 = vrot.slane %v360_v23, 2  ;;  %v1562_v51 = vpop.eup %1561  ;;  %v1797_v24 = vmul.f32 %v1560_v49, %v1714_v26  ;;  %v60_v26 = vld [vmem:[%s3195_s4 + $0xb0] sm:$0x1f] }
  0x40   :  { %v355_v36 = vadd.f32 %v354_v28, %v353_v20  ;;  %v368_v45 = vrot.slane %v367_v41, 2  ;;  %v1564_v53 = vpop.eup %1563  ;;  %3201 = vst [vmem:[#allocation2_spill] sm:$0xff] %v1782_v9  ;;  %v1800_v14 = vmul.f32 %v1562_v51, %v1718_v30  ;;  %v45_v28 = vld [vmem:[%s3195_s4 + $0x38] sm:$0x1f]  ;;  %v72_v51 = vld [vmem:[%s3195_s4 + $0x110] sm:$0x1f] }
  0x41   :  { %v349_v38 = vrot.slane %v348_v31, 1  ;;  %v362_v39 = vadd.f32 %v361_v32, %v360_v23  ;;  %3202 = vst [vmem:[#allocation3_spill] sm:$0xff] %v1797_v24  ;;  %v66_v32 = vld [vmem:[%s3195_s4 + $0xe0] sm:$0x1f]  ;;  %v92_v24 = vld [vmem:[%s3195_s4 + $0x1b0] sm:$0x1f] }
  0x42   :  { %v356_v40 = vrot.slane %v355_v36, 1  ;;  %v369_v47 = vadd.f32 %v368_v45, %v367_v41  ;;  %3203 = vst [vmem:[#allocation4_spill] sm:$0xff] %v1800_v14  ;;  %v61_v41 = vld [vmem:[%s3195_s4 + $0xb8] sm:$0x1f]  ;;  %v71_v45 = vld [vmem:[%s3195_s4 + $0x108] sm:$0x1f] }
  0x43   :  { %v350_v42 = vadd.f32 %v349_v38, %v348_v31  ;;  %v363_v43 = vrot.slane %v362_v39, 1  ;;  %v53_v31 = vld [vmem:[%s3195_s4 + $0x78] sm:$0x1f] }
  0x44   :  { %v357_v44 = vadd.f32 %v356_v40, %v355_v36  ;;  %v370_v50 = vrot.slane %v369_v47, 1  ;;  %v57_v40 = vld [vmem:[%s3195_s4 + $0x98] sm:$0x1f] }
  0x45   :  { %v364_v46 = vadd.f32 %v363_v43, %v362_v39  ;;  %1565 = vrcp.f32 %v350_v42  ;;  %v65_v42 = vld [vmem:[%s3195_s4 + $0xd8] sm:$0x1f] }
  0x46   :  { %1567 = vrcp.f32 %v357_v44  ;;  %v371_v60 = vadd.f32 %v370_v50, %v369_v47  ;;  %v69_v43 = vld [vmem:[%s3195_s4 + $0xf8] sm:$0x1f]  ;;  %v70_v44 = vld [vmem:[%s3195_s4 + $0x100] sm:$0x1f] }
  0x47   :  { %1569 = vrcp.f32 %v364_v46  ;;  %v93_v9 = vld [vmem:[%s3195_s4 + $0x1b8] sm:$0x1f] }
  0x48   :  { %1571 = vrcp.f32 %v371_v60 }
  0x4b   :  { %v1566_v62 = vpop.eup %1565 }
  0x4c   :  { %v1568_v4 = vpop.eup %1567  ;;  %v1785_v11 = vmul.f32 %v1566_v62, %v1729_v8  ;;  %v1803_v8 = vmul.f32 %v1564_v53, %v1722_v34  ;;  %v74_v53 = vld [vmem:[%s3195_s4 + $0x120] sm:$0x1f] }
  0x4d   :  { %v1570_v12 = vpop.eup %1569  ;;  %v1806_v61 = vmul.f32 %v1568_v4, %v1731_v10 }
  0x4e   :  { %3204 = vst [vmem:[#allocation5_spill] sm:$0xff] %v1803_v8  ;;  %v1818_v30 = vmul.f32 %v1570_v12, %v1735_v57  ;;  %v1821_v34 = vmul.f32 %v1785_v11, %v38_v52  ;;  %v1824_v10 = vmul.f32 %v1785_v11, %v42_v55  ;;  %v1827_v17 = vmul.f32 %v1785_v11, %v46_v1  ;;  %v64_v57 = vld [vmem:[%s3195_s4 + $0xd0] sm:$0x1f]  ;;  %v1572_v50 = vpop.eup %1571  ;;  %v73_v52 = vld [vmem:[%s3195_s4 + $0x118] sm:$0x1f] }
  0x4f   :  { %v1839_v20 = vmul.f32 %v1806_v61, %v39_v54  ;;  %v1842_v21 = vmul.f32 %v1806_v61, %v43_v56  ;;  %v1845_v22 = vmul.f32 %v1806_v61, %v47_v2  ;;  %v1848_v23 = vmul.f32 %v1785_v11, %v50_v5  ;;  %v75_v54 = vld [vmem:[%s3195_s4 + $0x128] sm:$0x1f]  ;;  %v78_v1 = vld [vmem:[%s3195_s4 + $0x140] sm:$0x1f]  ;;  %v81_v12 = vld [vmem:[%s3195_s4 + $0x158] sm:$0x1f] }
  0x50   :  { %v1872_v36 = vmul.f32 %v1818_v30, %v40_v63  ;;  %v1875_v37 = vmul.f32 %v1818_v30, %v44_v0  ;;  %v1878_v38 = vmul.f32 %v1818_v30, %v48_v3  ;;  %v1881_v39 = vmul.f32 %v1806_v61, %v51_v6  ;;  %v76_v63 = vld [vmem:[%s3195_s4 + $0x130] sm:$0x1f]  ;;  %v77_v0 = vld [vmem:[%s3195_s4 + $0x138] sm:$0x1f]  ;;  %v79_v2 = vld [vmem:[%s3195_s4 + $0x148] sm:$0x1f] }
  0x51   :  { %v1902_v46 = vmul.f32 %v1818_v30, %v52_v7  ;;  %v1905_v47 = vmul.f32 %v1785_v11, %v54_v13  ;;  %v1908_v48 = vmul.f32 %v1806_v61, %v55_v58  ;;  %v1911_v49 = vmul.f32 %v1818_v30, %v56_v59  ;;  %v80_v7 = vld [vmem:[%s3195_s4 + $0x150] sm:$0x1f]  ;;  %v83_v13 = vld [vmem:[%s3195_s4 + $0x168] sm:$0x1f] }
  0x52   :  { %v1926_v55 = vmul.f32 %v1785_v11, %v58_v15  ;;  %v1929_v56 = vmul.f32 %v1806_v61, %v59_v16  ;;  %v1932_v60 = vmul.f32 %v1818_v30, %v60_v26  ;;  %v1935_v62 = vmul.f32 %v1785_v11, %v62_v18  ;;  %v84_v26 = vld [vmem:[%s3195_s4 + $0x170] sm:$0x1f]  ;;  %v85_v18 = vld [vmem:[%s3195_s4 + $0x178] sm:$0x1f] }
  0x53   :  { %v1950_v3 = vmul.f32 %v1572_v50, %v1741_v25  ;;  %v1953_v4 = vmul.f32 %v1806_v61, %v63_v19  ;;  %v1956_v5 = vmul.f32 %v1818_v30, %v64_v57  ;;  %v1959_v6 = vmul.f32 %v1785_v11, %v66_v32  ;;  %v82_v25 = vld [vmem:[%s3195_s4 + $0x160] sm:$0x1f]  ;;  %v87_v57 = vld [vmem:[%s3195_s4 + $0x188] sm:$0x1f]  ;;  %v89_v50 = vld [vmem:[%s3195_s4 + $0x198] sm:$0x1f] }
  0x54   :  { %v1974_v58 = vmul.f32 %v1806_v61, %v67_v33  ;;  %v1977_v59 = vmul.f32 %v1818_v30, %v68_v35  ;;  %v1980_v15 = vmul.f32 %v1785_v11, %v70_v44  ;;  %v1983_v16 = vmul.f32 %v1806_v61, %v71_v45  ;;  %v86_v19 = vld [vmem:[%s3195_s4 + $0x180] sm:$0x1f]  ;;  %v88_v45 = vld [vmem:[%s3195_s4 + $0x190] sm:$0x1f] }
  0x55   :  { %v1998_v32 = vmul.f32 %v1950_v3, %v41_v27  ;;  %v2001_v33 = vmul.f32 %v1950_v3, %v45_v28  ;;  %v2004_v35 = vmul.f32 %v1950_v3, %v49_v29  ;;  %v2007_v44 = vmul.f32 %v1950_v3, %v53_v31  ;;  %v90_v27 = vld [vmem:[%s3195_s4 + $0x1a0] sm:$0x1f]  ;;  %v91_v28 = vld [vmem:[%s3195_s4 + $0x1a8] sm:$0x1f] }
  0x56   :  { %3205 = vst [vmem:[#allocation6_spill] sm:$0xff] %v1980_v15  ;;  %v2022_v29 = vmul.f32 %v1950_v3, %v57_v40  ;;  %v2025_v31 = vmul.f32 %v1950_v3, %v61_v41  ;;  %v2028_v8 = vmul.f32 %v1950_v3, %v65_v42  ;;  %v2031_v14 = vmul.f32 %v1950_v3, %v69_v43  ;;  %v94_v40 = vld [vmem:[%s3195_s4 + $0x1c0] sm:$0x1f]  ;;  %v95_v15 = vld [vmem:[%s3195_s4 + $0x1c8] sm:$0x1f] }
  0x57   :  { %3206 = vst [vmem:[#allocation7_spill] sm:$0xff] %v1983_v16  ;;  %v2043_v41 = vmul.f32 %v1818_v30, %v72_v51  ;;  %v2046_v42 = vmul.f32 %v1950_v3, %v73_v52  ;;  %v2049_v43 = vmul.f32 %v1785_v11, %v74_v53  ;;  %v2052_v16 = vmul.f32 %v1806_v61, %v75_v54  ;;  %v97_v51 = vld [vmem:[%s3195_s4 + $0x1d8] sm:$0x1f] }
  0x58   :  { %3207 = vst [vmem:[#allocation8_spill] sm:$0xff] %v2031_v14  ;;  %v96_v14 = vld [vmem:[%s3195_s4 + $0x1d0] sm:$0x1f]  ;;  %v2064_v52 = vmul.f32 %v1818_v30, %v76_v63  ;;  %v2067_v53 = vmul.f32 %v1950_v3, %v77_v0  ;;  %v2070_v54 = vmul.f32 %v1785_v11, %v78_v1  ;;  %v2085_v0 = vmul.f32 %v1818_v30, %v80_v7  ;;  %v103_v7 = vld [vmem:[%s3195_s4 + $0x208] sm:$0x1f] }
  0x59   :  { %3208 = vst [vmem:[#allocation9_spill] sm:$0xff] %v2046_v42  ;;  %v99_v42 = vld [vmem:[%s3195_s4 + $0x1e8] sm:$0x1f]  ;;  %v100_v63 = vld [vmem:[%s3195_s4 + $0x1f0] sm:$0x1f]  ;;  %v2088_v1 = vmul.f32 %v1950_v3, %v81_v12  ;;  %v2106_v12 = vmul.f32 %v1818_v30, %v84_v26 }
  0x5a   :  { %3209 = vst [vmem:[#allocation10_spill] sm:$0xff] %v2049_v43  ;;  %v98_v43 = vld [vmem:[%s3195_s4 + $0x1e0] sm:$0x1f] }
  0x5b   :  { %3210 = vst [vmem:[#allocation11_spill] sm:$0xff] %v2052_v16  ;;  %v2073_v16 = vmul.f32 %v1806_v61, %v79_v2  ;;  %v2091_v2 = vmul.f32 %v1785_v11, %v82_v25  ;;  %v2109_v25 = vmul.f32 %v1950_v3, %v85_v18  ;;  %v106_v26 = vld [vmem:[%s3195_s4 + $0x220] sm:$0x1f]  ;;  %v2127_v18 = vmul.f32 %v1818_v30, %v88_v45  ;;  %v109_v45 = vld [vmem:[%s3195_s4 + $0x238] sm:$0x1f] }
  0x5c   :  { %3211 = vst [vmem:[#allocation12_spill] sm:$0xff] %v2067_v53  ;;  %v102_v53 = vld [vmem:[%s3195_s4 + $0x200] sm:$0x1f] }
  0x5d   :  { %3212 = vst [vmem:[#allocation13_spill] sm:$0xff] %v2070_v54  ;;  %v101_v54 = vld [vmem:[%s3195_s4 + $0x1f8] sm:$0x1f] }
  0x5e   :  { %3213 = vst [vmem:[#allocation14_spill] sm:$0xff] %v2073_v16  ;;  %v2094_v16 = vmul.f32 %v1806_v61, %v83_v13  ;;  %v2112_v13 = vmul.f32 %v1785_v11, %v86_v19  ;;  %v2130_v19 = vmul.f32 %v1950_v3, %v89_v50  ;;  %v2148_v50 = vmul.f32 %v1818_v30, %v92_v24  ;;  %v112_v24 = vld [vmem:[%s3195_s4 + $0x250] sm:$0x1f] }
  0x5f   :  { %3214 = vst [vmem:[#allocation15_spill] sm:$0xff] %v2088_v1  ;;  %v105_v1 = vld [vmem:[%s3195_s4 + $0x218] sm:$0x1f] }
  0x60   :  { %3215 = vst [vmem:[#allocation16_spill] sm:$0xff] %v2091_v2  ;;  %v104_v2 = vld [vmem:[%s3195_s4 + $0x210] sm:$0x1f] }
  0x61   :  { %3216 = vst [vmem:[#allocation17_spill] sm:$0xff] %v2094_v16  ;;  %v2115_v16 = vmul.f32 %v1806_v61, %v87_v57  ;;  %v2133_v57 = vmul.f32 %v1785_v11, %v90_v27  ;;  %v2151_v27 = vmul.f32 %v1950_v3, %v93_v9  ;;  %v2169_v9 = vmul.f32 %v1818_v30, %v96_v14  ;;  %v115_v14 = vld [vmem:[%s3195_s4 + $0x268] sm:$0x1f] }
  0x62   :  { %3217 = vst [vmem:[#allocation18_spill] sm:$0xff] %v2109_v25  ;;  %v108_v25 = vld [vmem:[%s3195_s4 + $0x230] sm:$0x1f] }
  0x63   :  { %3218 = vst [vmem:[#allocation19_spill] sm:$0xff] %v2112_v13  ;;  %v107_v13 = vld [vmem:[%s3195_s4 + $0x228] sm:$0x1f] }
  0x64   :  { %3219 = vst [vmem:[#allocation20_spill] sm:$0xff] %v2115_v16  ;;  %v2136_v16 = vmul.f32 %v1806_v61, %v91_v28  ;;  %v2154_v28 = vmul.f32 %v1785_v11, %v94_v40  ;;  %v2172_v40 = vmul.f32 %v1950_v3, %v97_v51  ;;  %v2190_v51 = vmul.f32 %v1818_v30, %v100_v63 }
  0x65   :  { %3220 = vst [vmem:[#allocation21_spill] sm:$0xff] %v2130_v19  ;;  %v111_v19 = vld [vmem:[%s3195_s4 + $0x248] sm:$0x1f]  ;;  %v2208_v63 = vmul.f32 %v1818_v30, %v104_v2 }
  0x66   :  { %3221 = vst [vmem:[#allocation22_spill] sm:$0xff] %v2133_v57  ;;  %v110_v57 = vld [vmem:[%s3195_s4 + $0x240] sm:$0x1f]  ;;  %v2229_v2 = vmul.f32 %v1806_v61, %v111_v19  ;;  %v460_v19 = vsel %vm159_vm6, %v1821_v34, 0.0 }
  0x67   :  { %3222 = vst [vmem:[#allocation23_spill] sm:$0xff] %v2136_v16  ;;  %v2157_v16 = vmul.f32 %v1806_v61, %v95_v15  ;;  %v2175_v15 = vmul.f32 %v1785_v11, %v98_v43  ;;  %v2193_v43 = vmul.f32 %v1950_v3, %v101_v54  ;;  %v2211_v54 = vmul.f32 %v1950_v3, %v105_v1 }
  0x68   :  { %3223 = vst [vmem:[#allocation24_spill] sm:$0xff] %v2151_v27  ;;  %v114_v27 = vld [vmem:[%s3195_s4 + $0x260] sm:$0x1f]  ;;  %v2232_v1 = vmul.f32 %v1818_v30, %v112_v24  ;;  %v467_v24 = vsel %vm159_vm6, %v1839_v20, 0.0 }
  0x69   :  { %3224 = vst [vmem:[#allocation25_spill] sm:$0xff] %v2154_v28  ;;  %v113_v28 = vld [vmem:[%s3195_s4 + $0x258] sm:$0x1f] }
  0x6a   :  { %3225 = vst [vmem:[#allocation26_spill] sm:$0xff] %v2157_v16  ;;  %v2178_v16 = vmul.f32 %v1806_v61, %v99_v42  ;;  %v2196_v42 = vmul.f32 %v1785_v11, %v102_v53  ;;  %v2214_v53 = vmul.f32 %v1785_v11, %v106_v26  ;;  %v2235_v26 = vmul.f32 %v1950_v3, %v113_v28 }
  0x6b   :  { %3226 = vst [vmem:[#allocation27_spill] sm:$0xff] %v2172_v40  ;;  %v117_v40 = vld [vmem:[%s3195_s4 + $0x278] sm:$0x1f]  ;;  %v461_v28 = vrot.slane %v460_v19, 4 }
  0x6c   :  { %3227 = vst [vmem:[#allocation28_spill] sm:$0xff] %v2175_v15  ;;  %v116_v15 = vld [vmem:[%s3195_s4 + $0x270] sm:$0x1f] }
  0x6d   :  { %3228 = vst [vmem:[#allocation29_spill] sm:$0xff] %v2178_v16  ;;  %v2199_v16 = vmul.f32 %v1806_v61, %v103_v7  ;;  %v2217_v7 = vmul.f32 %v1806_v61, %v107_v13  ;;  %v2238_v13 = vmul.f32 %v1785_v11, %v114_v27  ;;  %v462_v34 = vadd.f32 %v461_v28, %v460_v19 }
  0x6e   :  { %3229 = vst [vmem:[#allocation30_spill] sm:$0xff] %v2193_v43  ;;  %v2226_v43 = vmul.f32 %v1785_v11, %v110_v57  ;;  %v2247_v57 = vmul.f32 %v1950_v3, %v117_v40  ;;  %v474_v11 = vsel %vm159_vm6, %v1872_v36, 0.0  ;;  %v495_v40 = vsel %vm159_vm6, %v1842_v21, 0.0 }
  0x6f   :  { %3230 = vst [vmem:[#allocation31_spill] sm:$0xff] %v2196_v42  ;;  %v2223_v42 = vmul.f32 %v1950_v3, %v109_v45  ;;  %v2244_v45 = vmul.f32 %v1818_v30, %v116_v15  ;;  %v475_v27 = vrot.slane %v474_v11, 4  ;;  %v488_v3 = vsel %vm159_vm6, %v1824_v10, 0.0 }
  0x70   :  { %3231 = vst [vmem:[#allocation32_spill] sm:$0xff] %v2199_v16  ;;  %v2220_v16 = vmul.f32 %v1818_v30, %v108_v25  ;;  %v2241_v25 = vmul.f32 %v1806_v61, %v115_v14  ;;  %v481_v61 = vsel %vm169_vm7, %v1998_v32, 0.0  ;;  %v489_v14 = vrot.slane %v488_v3, 4 }
  0x71   :  { %3232 = vst [vmem:[#allocation33_spill] sm:$0xff] %v2211_v54  ;;  %v482_v30 = vrot.slane %v481_v61, 4  ;;  %v496_v20 = vrot.slane %v495_v40, 4  ;;  %v502_v36 = vsel %vm159_vm6, %v1875_v37, 0.0  ;;  %v509_v32 = vsel %vm169_vm7, %v2001_v33, 0.0 }
  0x72   :  { %3233 = vst [vmem:[#allocation34_spill] sm:$0xff] %v2214_v53  ;;  %v510_v21 = vrot.slane %v509_v32, 4 }
  0x73   :  { %3234 = vst [vmem:[#allocation35_spill] sm:$0xff] %v2217_v7 }
  0x74   :  { %3235 = vst [vmem:[#allocation36_spill] sm:$0xff] %v2220_v16 }
  0x75   :  { %3236 = vst [vmem:[#allocation37_spill] sm:$0xff] %v2223_v42  ;;  %v503_v42 = vrot.slane %v502_v36, 4 }
  0x76   :  { %3237 = vst [vmem:[#allocation38_spill] sm:$0xff] %v2226_v43 }
  0x77   :  { %3238 = vst [vmem:[#allocation39_spill] sm:$0xff] %v2229_v2  ;;  %v497_v2 = vadd.f32 %v496_v20, %v495_v40 }
  0x78   :  { %3239 = vst [vmem:[#allocation40_spill] sm:$0xff] %v2232_v1  ;;  %v490_v1 = vadd.f32 %v489_v14, %v488_v3 }
  0x79   :  { %3240 = vst [vmem:[#allocation41_spill] sm:$0xff] %v2235_v26  ;;  %v468_v26 = vrot.slane %v467_v24, 4  ;;  %v498_v28 = vrot.slane %v497_v2, 2 }
  0x7a   :  { %3241 = vst [vmem:[#allocation42_spill] sm:$0xff] %v2238_v13 }
  0x7b   :  { %3242 = vst [vmem:[#allocation43_spill] sm:$0xff] %v2241_v25  ;;  %v469_v15 = vadd.f32 %v468_v26, %v467_v24  ;;  %v463_v25 = vrot.slane %v462_v34, 2  ;;  %v491_v24 = vrot.slane %v490_v1, 2  ;;  %v499_v33 = vadd.f32 %v498_v28, %v497_v2 }
  0x7c   :  { %3243 = vst [vmem:[#allocation44_spill] sm:$0xff] %v2244_v45  ;;  %v483_v45 = vadd.f32 %v482_v30, %v481_v61  ;;  %v511_v30 = vadd.f32 %v510_v21, %v509_v32  ;;  %v516_v2 = vsel %vm159_vm6, %v1827_v17, 0.0  ;;  %v551_v21 = vsel %vm159_vm6, %v1881_v39, 0.0 }
  0x7d   :  { %3244 = vst [vmem:[#allocation45_spill] sm:$0xff] %v2247_v57  ;;  %v476_v57 = vadd.f32 %v475_v27, %v474_v11  ;;  %v470_v13 = vrot.slane %v469_v15, 2  ;;  %v464_v19 = vadd.f32 %v463_v25, %v462_v34  ;;  %v504_v27 = vadd.f32 %v503_v42, %v502_v36 }
  0x7e   :  { %v484_v43 = vrot.slane %v483_v45, 2  ;;  %v492_v7 = vadd.f32 %v491_v24, %v490_v1  ;;  %v512_v40 = vrot.slane %v511_v30, 2  ;;  %v517_v32 = vrot.slane %v516_v2, 4 }
  0x7f   :  { %v477_v10 = vrot.slane %v476_v57, 2  ;;  %v471_v26 = vadd.f32 %v470_v13, %v469_v15  ;;  %v465_v37 = vrot.slane %v464_v19, 1  ;;  %v505_v3 = vrot.slane %v504_v27, 2 }
  0x80   :  { %v485_v61 = vadd.f32 %v484_v43, %v483_v45  ;;  %v493_v25 = vrot.slane %v492_v7, 1  ;;  %v500_v13 = vrot.slane %v499_v33, 1  ;;  %v513_v42 = vadd.f32 %v512_v40, %v511_v30 }
  0x81   :  { %v478_v11 = vadd.f32 %v477_v10, %v476_v57  ;;  %v472_v16 = vrot.slane %v471_v26, 1  ;;  %v2265_v14 = vadd.f32 %v465_v37, %v464_v19  ;;  %v506_v43 = vadd.f32 %v505_v3, %v504_v27 }
  0x82   :  { %v486_v54 = vrot.slane %v485_v61, 1  ;;  %v2273_v45 = vadd.f32 %v493_v25, %v492_v7  ;;  %v2275_v1 = vadd.f32 %v500_v13, %v499_v33  ;;  %v523_v15 = vsel %vm159_vm6, %v1845_v22, 0.0 }
  0x83   :  { %v479_v53 = vrot.slane %v478_v11, 1  ;;  %v2267_v20 = vadd.f32 %v472_v16, %v471_v26  ;;  %v507_v16 = vrot.slane %v506_v43, 1  ;;  %v514_v36 = vrot.slane %v513_v42, 1 }
  0x84   :  { %v2271_v57 = vadd.f32 %v486_v54, %v485_v61  ;;  %v524_v10 = vrot.slane %v523_v15, 4  ;;  %v530_v54 = vsel %vm159_vm6, %v1878_v38, 0.0  ;;  %v544_v7 = vsel %vm159_vm6, %v1848_v23, 0.0 }
  0x85   :  { %v2269_v34 = vadd.f32 %v479_v53, %v478_v11  ;;  %v537_v53 = vsel %vm169_vm7, %v2004_v35, 0.0  ;;  %v2289_v17 = vadd.f32 %v507_v16, %v506_v43  ;;  %v2291_v19 = vadd.f32 %v514_v36, %v513_v42 }
  0x86   :  { %v518_v22 = vadd.f32 %v517_v32, %v516_v2  ;;  %v525_v26 = vadd.f32 %v524_v10, %v523_v15  ;;  %v531_v24 = vrot.slane %v530_v54, 4  ;;  %v538_v28 = vrot.slane %v537_v53, 4 }
  0x87   :  { %3245 = vst [vmem:[#allocation46_spill] sm:$0xff] %v2289_v17  ;;  %v545_v11 = vrot.slane %v544_v7, 4  ;;  %v552_v61 = vrot.slane %v551_v21, 4  ;;  %v558_v35 = vsel %vm159_vm6, %v1902_v46, 0.0  ;;  %v565_v23 = vsel %vm169_vm7, %v2007_v44, 0.0 }
  0x88   :  { %3246 = vst [vmem:[#allocation47_spill] sm:$0xff] %v2291_v19  ;;  %v519_v38 = vrot.slane %v518_v22, 2  ;;  %v526_v27 = vrot.slane %v525_v26, 2  ;;  %v532_v30 = vadd.f32 %v531_v24, %v530_v54  ;;  %v539_v39 = vadd.f32 %v538_v28, %v537_v53 }
  0x89   :  { %v546_v37 = vadd.f32 %v545_v11, %v544_v7  ;;  %v553_v33 = vadd.f32 %v552_v61, %v551_v21  ;;  %v559_v25 = vrot.slane %v558_v35, 4  ;;  %v566_v13 = vrot.slane %v565_v23, 4 }
  0x8a   :  { %v520_v3 = vadd.f32 %v519_v38, %v518_v22  ;;  %v527_v40 = vadd.f32 %v526_v27, %v525_v26  ;;  %v533_v43 = vrot.slane %v532_v30, 2  ;;  %v540_v42 = vrot.slane %v539_v39, 2 }
  0x8b   :  { %v547_v2 = vrot.slane %v546_v37, 2  ;;  %v554_v15 = vrot.slane %v553_v33, 2  ;;  %v560_v32 = vadd.f32 %v559_v25, %v558_v35  ;;  %v567_v10 = vadd.f32 %v566_v13, %v565_v23 }
  0x8c   :  { %v521_v16 = vrot.slane %v520_v3, 1  ;;  %v528_v36 = vrot.slane %v527_v40, 1  ;;  %v534_v46 = vadd.f32 %v533_v43, %v532_v30  ;;  %v541_v19 = vadd.f32 %v540_v42, %v539_v39 }
  0x8d   :  { %v548_v17 = vadd.f32 %v547_v2, %v546_v37  ;;  %v555_v44 = vadd.f32 %v554_v15, %v553_v33  ;;  %v561_v7 = vrot.slane %v560_v32, 2  ;;  %v568_v21 = vrot.slane %v567_v10, 2 }
  0x8e   :  { %v2297_v54 = vadd.f32 %v521_v16, %v520_v3  ;;  %v2299_v53 = vadd.f32 %v528_v36, %v527_v40  ;;  %v535_v22 = vrot.slane %v534_v46, 1  ;;  %v542_v26 = vrot.slane %v541_v19, 1 }
  0x8f   :  { %v549_v24 = vrot.slane %v548_v17, 1  ;;  %v556_v28 = vrot.slane %v555_v44, 1  ;;  %v562_v11 = vadd.f32 %v561_v7, %v560_v32  ;;  %v569_v61 = vadd.f32 %v568_v21, %v567_v10 }
  0x90   :  { %v572_v38 = vsel %vm159_vm6, %v1905_v47, 0.0  ;;  %v579_v27 = vsel %vm159_vm6, %v1908_v48, 0.0  ;;  %v2305_v35 = vadd.f32 %v535_v22, %v534_v46  ;;  %v2307_v23 = vadd.f32 %v542_v26, %v541_v19 }
  0x91   :  { %v2309_v30 = vadd.f32 %v549_v24, %v548_v17  ;;  %v2311_v39 = vadd.f32 %v556_v28, %v555_v44  ;;  %v563_v37 = vrot.slane %v562_v11, 1  ;;  %v570_v33 = vrot.slane %v569_v61, 1 }
  0x92   :  { %v573_v3 = vrot.slane %v572_v38, 4  ;;  %v580_v40 = vrot.slane %v579_v27, 4  ;;  %v586_v25 = vsel %vm159_vm6, %v1911_v49, 0.0  ;;  %v593_v47 = vsel %vm169_vm7, %v2022_v29, 0.0 }
  0x93   :  { %v600_v48 = vsel %vm159_vm6, %v1926_v55, 0.0  ;;  %v607_v19 = vsel %vm159_vm6, %v1929_v56, 0.0  ;;  %v2321_v17 = vadd.f32 %v563_v37, %v562_v11  ;;  %v2323_v13 = vadd.f32 %v570_v33, %v569_v61 }
  0x94   :  { %v574_v43 = vadd.f32 %v573_v3, %v572_v38  ;;  %v581_v42 = vadd.f32 %v580_v40, %v579_v27  ;;  %v587_v2 = vrot.slane %v586_v25, 4  ;;  %v594_v15 = vrot.slane %v593_v47, 4 }
  0x95   :  { %v601_v16 = vrot.slane %v600_v48, 4  ;;  %v608_v36 = vrot.slane %v607_v19, 4  ;;  %v614_v29 = vsel %vm159_vm6, %v1932_v60, 0.0  ;;  %v621_v55 = vsel %vm169_vm7, %v2025_v31, 0.0 }
  0x96   :  { %v575_v49 = vrot.slane %v574_v43, 2  ;;  %v582_v32 = vrot.slane %v581_v42, 2  ;;  %v588_v10 = vadd.f32 %v587_v2, %v586_v25  ;;  %v595_v56 = vadd.f32 %v594_v15, %v593_v47 }
  0x97   :  { %v602_v46 = vadd.f32 %v601_v16, %v600_v48  ;;  %v609_v44 = vadd.f32 %v608_v36, %v607_v19  ;;  %v615_v22 = vrot.slane %v614_v29, 4  ;;  %v622_v26 = vrot.slane %v621_v55, 4 }
  0x98   :  { %v576_v7 = vadd.f32 %v575_v49, %v574_v43  ;;  %v583_v21 = vadd.f32 %v582_v32, %v581_v42  ;;  %v589_v24 = vrot.slane %v588_v10, 2  ;;  %v596_v28 = vrot.slane %v595_v56, 2 }
  0x99   :  { %v603_v11 = vrot.slane %v602_v46, 2  ;;  %v610_v61 = vrot.slane %v609_v44, 2  ;;  %v616_v37 = vadd.f32 %v615_v22, %v614_v29  ;;  %v623_v33 = vadd.f32 %v622_v26, %v621_v55 }
  0x9a   :  { %v577_v38 = vrot.slane %v576_v7, 1  ;;  %v584_v27 = vrot.slane %v583_v21, 1  ;;  %v590_v60 = vadd.f32 %v589_v24, %v588_v10  ;;  %v597_v3 = vadd.f32 %v596_v28, %v595_v56 }
  0x9b   :  { %v604_v40 = vadd.f32 %v603_v11, %v602_v46  ;;  %v611_v31 = vadd.f32 %v610_v61, %v609_v44  ;;  %v617_v48 = vrot.slane %v616_v37, 2  ;;  %v624_v19 = vrot.slane %v623_v33, 2 }
  0x9c   :  { %v2329_v25 = vadd.f32 %v577_v38, %v576_v7  ;;  %v2331_v47 = vadd.f32 %v584_v27, %v583_v21  ;;  %v591_v43 = vrot.slane %v590_v60, 1  ;;  %v598_v42 = vrot.slane %v597_v3, 1 }
  0x9d   :  { %v605_v2 = vrot.slane %v604_v40, 1  ;;  %v612_v15 = vrot.slane %v611_v31, 1  ;;  %v618_v16 = vadd.f32 %v617_v48, %v616_v37  ;;  %v625_v36 = vadd.f32 %v624_v19, %v623_v33 }
  0x9e   :  { %v628_v49 = vsel %vm159_vm6, %v1935_v62, 0.0  ;;  %v635_v32 = vsel %vm159_vm6, %v1953_v4, 0.0  ;;  %v2337_v29 = vadd.f32 %v591_v43, %v590_v60  ;;  %v2339_v55 = vadd.f32 %v598_v42, %v597_v3  ;;  %v3248_v3 = vld [vmem:[#allocation8_spill] sm:$0xff] }
  0x9f   :  { %v2341_v10 = vadd.f32 %v605_v2, %v604_v40  ;;  %v2343_v56 = vadd.f32 %v612_v15, %v611_v31  ;;  %v619_v46 = vrot.slane %v618_v16, 1  ;;  %v626_v44 = vrot.slane %v625_v36, 1 }
  0xa0   :  { %v629_v7 = vrot.slane %v628_v49, 4  ;;  %v636_v21 = vrot.slane %v635_v32, 4  ;;  %v642_v22 = vsel %vm159_vm6, %v1956_v5, 0.0  ;;  %v649_v62 = vsel %vm169_vm7, %v2028_v8, 0.0 }
  0xa1   :  { %v656_v4 = vsel %vm159_vm6, %v1959_v6, 0.0  ;;  %v663_v26 = vsel %vm159_vm6, %v1974_v58, 0.0  ;;  %v2353_v24 = vadd.f32 %v619_v46, %v618_v16  ;;  %v2355_v28 = vadd.f32 %v626_v44, %v625_v36 }
  0xa2   :  { %v630_v11 = vadd.f32 %v629_v7, %v628_v49  ;;  %v637_v61 = vadd.f32 %v636_v21, %v635_v32  ;;  %v643_v38 = vrot.slane %v642_v22, 4  ;;  %v650_v27 = vrot.slane %v649_v62, 4 }
  0xa3   :  { %3247 = vst [vmem:[#allocation48_spill] sm:$0xff] %v2355_v28  ;;  %v657_v37 = vrot.slane %v656_v4, 4  ;;  %v664_v33 = vrot.slane %v663_v26, 4  ;;  %v670_v8 = vsel %vm159_vm6, %v1977_v59, 0.0  ;;  %v677_v6 = vsel %vm169_vm7, %v3248_v3, 0.0 }
  0xa4   :  { %v631_v5 = vrot.slane %v630_v11, 2  ;;  %v638_v60 = vrot.slane %v637_v61, 2  ;;  %v644_v40 = vadd.f32 %v643_v38, %v642_v22  ;;  %v651_v58 = vadd.f32 %v650_v27, %v649_v62 }
  0xa5   :  { %v658_v31 = vadd.f32 %v657_v37, %v656_v4  ;;  %v665_v48 = vadd.f32 %v664_v33, %v663_v26  ;;  %v671_v42 = vrot.slane %v670_v8, 4  ;;  %v678_v2 = vrot.slane %v677_v6, 4 }
  0xa6   :  { %v632_v19 = vadd.f32 %v631_v5, %v630_v11  ;;  %v639_v43 = vadd.f32 %v638_v60, %v637_v61  ;;  %v645_v15 = vrot.slane %v644_v40, 2  ;;  %v652_v16 = vrot.slane %v651_v58, 2  ;;  %v3249_v5 = vld [vmem:[#allocation6_spill] sm:$0xff] }
  0xa7   :  { %v659_v36 = vrot.slane %v658_v31, 2  ;;  %v666_v49 = vrot.slane %v665_v48, 2  ;;  %v672_v44 = vadd.f32 %v671_v42, %v670_v8  ;;  %v679_v7 = vadd.f32 %v678_v2, %v677_v6  ;;  %v3250_v8 = vld [vmem:[#allocation7_spill] sm:$0xff] }
  0xa8   :  { %v633_v32 = vrot.slane %v632_v19, 1  ;;  %v640_v46 = vrot.slane %v639_v43, 1  ;;  %v646_v59 = vadd.f32 %v645_v15, %v644_v40  ;;  %v653_v21 = vadd.f32 %v652_v16, %v651_v58  ;;  %v3255_v16 = vld [vmem:[#allocation9_spill] sm:$0xff] }
  0xa9   :  { %v660_v28 = vadd.f32 %v659_v36, %v658_v31  ;;  %v667_v3 = vadd.f32 %v666_v49, %v665_v48  ;;  %v673_v4 = vrot.slane %v672_v44, 2  ;;  %v680_v26 = vrot.slane %v679_v7, 2  ;;  %v3256_v49 = vld [vmem:[#allocation10_spill] sm:$0xff] }
  0xaa   :  { %v2361_v22 = vadd.f32 %v633_v32, %v632_v19  ;;  %v2363_v62 = vadd.f32 %v640_v46, %v639_v43  ;;  %v647_v11 = vrot.slane %v646_v59, 1  ;;  %v654_v61 = vrot.slane %v653_v21, 1  ;;  %v3257_v46 = vld [vmem:[#allocation11_spill] sm:$0xff] }
  0xab   :  { %v661_v38 = vrot.slane %v660_v28, 1  ;;  %v668_v27 = vrot.slane %v667_v3, 1  ;;  %v674_v37 = vadd.f32 %v673_v4, %v672_v44  ;;  %v681_v33 = vadd.f32 %v680_v26, %v679_v7 }
  0xac   :  { %v684_v60 = vsel %vm159_vm6, %v3249_v5, 0.0  ;;  %v691_v6 = vsel %vm159_vm6, %v3250_v8, 0.0  ;;  %v2369_v40 = vadd.f32 %v647_v11, %v646_v59  ;;  %v2371_v58 = vadd.f32 %v654_v61, %v653_v21 }
  0xad   :  { %v2373_v31 = vadd.f32 %v661_v38, %v660_v28  ;;  %v2375_v48 = vadd.f32 %v668_v27, %v667_v3  ;;  %v675_v19 = vrot.slane %v674_v37, 1  ;;  %v682_v43 = vrot.slane %v681_v33, 1  ;;  %v3260_v27 = vld [vmem:[#allocation12_spill] sm:$0xff] }
  0xae   :  { %3251 = vst [vmem:[#allocation8_spill] sm:$0xff] %v2369_v40  ;;  %v685_v42 = vrot.slane %v684_v60, 4  ;;  %v692_v2 = vrot.slane %v691_v6, 4  ;;  %v698_v15 = vsel %vm159_vm6, %v2043_v41, 0.0  ;;  %v705_v36 = vsel %vm169_vm7, %v3255_v16, 0.0 }
  0xaf   :  { %3252 = vst [vmem:[#allocation6_spill] sm:$0xff] %v2371_v58  ;;  %v712_v32 = vsel %vm159_vm6, %v3256_v49, 0.0  ;;  %v719_v44 = vsel %vm159_vm6, %v3257_v46, 0.0  ;;  %v2385_v28 = vadd.f32 %v675_v19, %v674_v37  ;;  %v2387_v7 = vadd.f32 %v682_v43, %v681_v33 }
  0xb0   :  { %3253 = vst [vmem:[#allocation7_spill] sm:$0xff] %v2373_v31  ;;  %v686_v59 = vadd.f32 %v685_v42, %v684_v60  ;;  %v693_v21 = vadd.f32 %v692_v2, %v691_v6  ;;  %v699_v3 = vrot.slane %v698_v15, 4  ;;  %v706_v4 = vrot.slane %v705_v36, 4 }
  0xb1   :  { %3254 = vst [vmem:[#allocation49_spill] sm:$0xff] %v2375_v48  ;;  %v713_v26 = vrot.slane %v712_v32, 4  ;;  %v720_v11 = vrot.slane %v719_v44, 4  ;;  %v726_v38 = vsel %vm159_vm6, %v2064_v52, 0.0  ;;  %v733_v5 = vsel %vm169_vm7, %v3260_v27, 0.0 }
  0xb2   :  { %3258 = vst [vmem:[#allocation9_spill] sm:$0xff] %v2385_v28  ;;  %v687_v41 = vrot.slane %v686_v59, 2  ;;  %v694_v61 = vrot.slane %v693_v21, 2  ;;  %v700_v8 = vadd.f32 %v699_v3, %v698_v15  ;;  %v707_v16 = vadd.f32 %v706_v4, %v705_v36 }
  0xb3   :  { %3259 = vst [vmem:[#allocation10_spill] sm:$0xff] %v2387_v7  ;;  %v714_v37 = vadd.f32 %v713_v26, %v712_v32  ;;  %v721_v19 = vadd.f32 %v720_v11, %v719_v44  ;;  %v727_v60 = vrot.slane %v726_v38, 4  ;;  %v734_v6 = vrot.slane %v733_v5, 4 }
  0xb4   :  { %v688_v33 = vadd.f32 %v687_v41, %v686_v59  ;;  %v695_v43 = vadd.f32 %v694_v61, %v693_v21  ;;  %v701_v42 = vrot.slane %v700_v8, 2  ;;  %v708_v2 = vrot.slane %v707_v16, 2  ;;  %v3261_v41 = vld [vmem:[#allocation13_spill] sm:$0xff] }
  0xb5   :  { %v715_v49 = vrot.slane %v714_v37, 2  ;;  %v722_v46 = vrot.slane %v721_v19, 2  ;;  %v728_v48 = vadd.f32 %v727_v60, %v726_v38  ;;  %v735_v31 = vadd.f32 %v734_v6, %v733_v5  ;;  %v3262_v38 = vld [vmem:[#allocation14_spill] sm:$0xff]  ;;  %v3268_v6 = vld [vmem:[#allocation16_spill] sm:$0xff] }
  0xb6   :  { %v689_v7 = vrot.slane %v688_v33, 1  ;;  %v696_v28 = vrot.slane %v695_v43, 1  ;;  %v702_v52 = vadd.f32 %v701_v42, %v700_v8  ;;  %v709_v58 = vadd.f32 %v708_v2, %v707_v16  ;;  %v3269_v2 = vld [vmem:[#allocation17_spill] sm:$0xff] }
  0xb7   :  { %v716_v40 = vadd.f32 %v715_v49, %v714_v37  ;;  %v723_v27 = vadd.f32 %v722_v46, %v721_v19  ;;  %v729_v32 = vrot.slane %v728_v48, 2  ;;  %v736_v44 = vrot.slane %v735_v31, 2 }
  0xb8   :  { %v2393_v15 = vadd.f32 %v689_v7, %v688_v33  ;;  %v2395_v36 = vadd.f32 %v696_v28, %v695_v43  ;;  %v703_v59 = vrot.slane %v702_v52, 1  ;;  %v710_v21 = vrot.slane %v709_v58, 1 }
  0xb9   :  { %v717_v3 = vrot.slane %v716_v40, 1  ;;  %v724_v4 = vrot.slane %v723_v27, 1  ;;  %v730_v26 = vadd.f32 %v729_v32, %v728_v48  ;;  %v737_v11 = vadd.f32 %v736_v44, %v735_v31  ;;  %v3267_v48 = vld [vmem:[#allocation15_spill] sm:$0xff] }
  0xba   :  { %v740_v61 = vsel %vm159_vm6, %v3261_v41, 0.0  ;;  %v747_v5 = vsel %vm159_vm6, %v3262_v38, 0.0  ;;  %v2401_v8 = vadd.f32 %v703_v59, %v702_v52  ;;  %v2403_v7 = vadd.f32 %v710_v21, %v709_v58 }
  0xbb   :  { %v2405_v28 = vadd.f32 %v717_v3, %v716_v40  ;;  %v2407_v16 = vadd.f32 %v724_v4, %v723_v27  ;;  %v731_v37 = vrot.slane %v730_v26, 1  ;;  %v738_v19 = vrot.slane %v737_v11, 1  ;;  %v3272_v4 = vld [vmem:[#allocation18_spill] sm:$0xff] }
  0xbc   :  { %3263 = vst [vmem:[#allocation11_spill] sm:$0xff] %v2401_v8  ;;  %v741_v33 = vrot.slane %v740_v61, 4  ;;  %v748_v43 = vrot.slane %v747_v5, 4  ;;  %v754_v31 = vsel %vm159_vm6, %v2085_v0, 0.0  ;;  %v761_v60 = vsel %vm169_vm7, %v3267_v48, 0.0 }
  0xbd   :  { %3264 = vst [vmem:[#allocation12_spill] sm:$0xff] %v2403_v7  ;;  %v768_v42 = vsel %vm159_vm6, %v3268_v6, 0.0  ;;  %v775_v58 = vsel %vm159_vm6, %v3269_v2, 0.0  ;;  %v2417_v40 = vadd.f32 %v731_v37, %v730_v26  ;;  %v2419_v49 = vadd.f32 %v738_v19, %v737_v11 }
  0xbe   :  { %3265 = vst [vmem:[#allocation13_spill] sm:$0xff] %v2405_v28  ;;  %v742_v46 = vadd.f32 %v741_v33, %v740_v61  ;;  %v749_v52 = vadd.f32 %v748_v43, %v747_v5  ;;  %v755_v27 = vrot.slane %v754_v31, 4  ;;  %v762_v32 = vrot.slane %v761_v60, 4 }
  0xbf   :  { %3266 = vst [vmem:[#allocation14_spill] sm:$0xff] %v2407_v16  ;;  %v769_v44 = vrot.slane %v768_v42, 4  ;;  %v776_v59 = vrot.slane %v775_v58, 4  ;;  %v782_v3 = vsel %vm159_vm6, %v2106_v12, 0.0  ;;  %v789_v41 = vsel %vm169_vm7, %v3272_v4, 0.0 }
  0xc0   :  { %3270 = vst [vmem:[#allocation15_spill] sm:$0xff] %v2417_v40  ;;  %v743_v0 = vrot.slane %v742_v46, 2  ;;  %v750_v21 = vrot.slane %v749_v52, 2  ;;  %v756_v38 = vadd.f32 %v755_v27, %v754_v31  ;;  %v763_v48 = vadd.f32 %v762_v32, %v761_v60 }
  0xc1   :  { %3271 = vst [vmem:[#allocation16_spill] sm:$0xff] %v2419_v49  ;;  %v770_v26 = vadd.f32 %v769_v44, %v768_v42  ;;  %v777_v37 = vadd.f32 %v776_v59, %v775_v58  ;;  %v783_v61 = vrot.slane %v782_v3, 4  ;;  %v790_v5 = vrot.slane %v789_v41, 4 }
  0xc2   :  { %v744_v11 = vadd.f32 %v743_v0, %v742_v46  ;;  %v751_v19 = vadd.f32 %v750_v21, %v749_v52  ;;  %v757_v33 = vrot.slane %v756_v38, 2  ;;  %v764_v43 = vrot.slane %v763_v48, 2  ;;  %v3273_v0 = vld [vmem:[#allocation19_spill] sm:$0xff] }
  0xc3   :  { %v771_v6 = vrot.slane %v770_v26, 2  ;;  %v778_v2 = vrot.slane %v777_v37, 2  ;;  %v784_v16 = vadd.f32 %v783_v61, %v782_v3  ;;  %v791_v28 = vadd.f32 %v790_v5, %v789_v41  ;;  %v3274_v3 = vld [vmem:[#allocation20_spill] sm:$0xff]  ;;  %v3280_v5 = vld [vmem:[#allocation22_spill] sm:$0xff] }
  0xc4   :  { %v745_v49 = vrot.slane %v744_v11, 1  ;;  %v752_v40 = vrot.slane %v751_v19, 1  ;;  %v758_v12 = vadd.f32 %v757_v33, %v756_v38  ;;  %v765_v7 = vadd.f32 %v764_v43, %v763_v48  ;;  %v3281_v43 = vld [vmem:[#allocation23_spill] sm:$0xff] }
  0xc5   :  { %v772_v8 = vadd.f32 %v771_v6, %v770_v26  ;;  %v779_v4 = vadd.f32 %v778_v2, %v777_v37  ;;  %v785_v42 = vrot.slane %v784_v16, 2  ;;  %v792_v58 = vrot.slane %v791_v28, 2 }
  0xc6   :  { %v2425_v31 = vadd.f32 %v745_v49, %v744_v11  ;;  %v2427_v60 = vadd.f32 %v752_v40, %v751_v19  ;;  %v759_v46 = vrot.slane %v758_v12, 1  ;;  %v766_v52 = vrot.slane %v765_v7, 1 }
  0xc7   :  { %v773_v27 = vrot.slane %v772_v8, 1  ;;  %v780_v32 = vrot.slane %v779_v4, 1  ;;  %v786_v44 = vadd.f32 %v785_v42, %v784_v16  ;;  %v793_v59 = vadd.f32 %v792_v58, %v791_v28  ;;  %v3279_v16 = vld [vmem:[#allocation21_spill] sm:$0xff] }
  0xc8   :  { %v796_v21 = vsel %vm159_vm6, %v3273_v0, 0.0  ;;  %v803_v41 = vsel %vm159_vm6, %v3274_v3, 0.0  ;;  %v2433_v38 = vadd.f32 %v759_v46, %v758_v12  ;;  %v2435_v49 = vadd.f32 %v766_v52, %v765_v7 }
  0xc9   :  { %v2437_v40 = vadd.f32 %v773_v27, %v772_v8  ;;  %v2439_v48 = vadd.f32 %v780_v32, %v779_v4  ;;  %v787_v26 = vrot.slane %v786_v44, 1  ;;  %v794_v37 = vrot.slane %v793_v59, 1  ;;  %v3284_v32 = vld [vmem:[#allocation24_spill] sm:$0xff] }
  0xca   :  { %3275 = vst [vmem:[#allocation17_spill] sm:$0xff] %v2433_v38  ;;  %v797_v11 = vrot.slane %v796_v21, 4  ;;  %v804_v19 = vrot.slane %v803_v41, 4  ;;  %v810_v28 = vsel %vm159_vm6, %v2127_v18, 0.0  ;;  %v817_v61 = vsel %vm169_vm7, %v3279_v16, 0.0 }
  0xcb   :  { %3276 = vst [vmem:[#allocation18_spill] sm:$0xff] %v2435_v49  ;;  %v824_v33 = vsel %vm159_vm6, %v3280_v5, 0.0  ;;  %v831_v7 = vsel %vm159_vm6, %v3281_v43, 0.0  ;;  %v2449_v8 = vadd.f32 %v787_v26, %v786_v44  ;;  %v2451_v6 = vadd.f32 %v794_v37, %v793_v59 }
  0xcc   :  { %3277 = vst [vmem:[#allocation19_spill] sm:$0xff] %v2437_v40  ;;  %v798_v2 = vadd.f32 %v797_v11, %v796_v21  ;;  %v805_v12 = vadd.f32 %v804_v19, %v803_v41  ;;  %v811_v4 = vrot.slane %v810_v28, 4  ;;  %v818_v42 = vrot.slane %v817_v61, 4 }
  0xcd   :  { %3278 = vst [vmem:[#allocation20_spill] sm:$0xff] %v2439_v48  ;;  %v825_v58 = vrot.slane %v824_v33, 4  ;;  %v832_v46 = vrot.slane %v831_v7, 4  ;;  %v838_v27 = vsel %vm159_vm6, %v2148_v50, 0.0  ;;  %v845_v0 = vsel %vm169_vm7, %v3284_v32, 0.0 }
  0xce   :  { %3282 = vst [vmem:[#allocation21_spill] sm:$0xff] %v2449_v8  ;;  %v799_v18 = vrot.slane %v798_v2, 2  ;;  %v806_v52 = vrot.slane %v805_v12, 2  ;;  %v812_v3 = vadd.f32 %v811_v4, %v810_v28  ;;  %v819_v16 = vadd.f32 %v818_v42, %v817_v61 }
  0xcf   :  { %3283 = vst [vmem:[#allocation22_spill] sm:$0xff] %v2451_v6  ;;  %v826_v44 = vadd.f32 %v825_v58, %v824_v33  ;;  %v833_v26 = vadd.f32 %v832_v46, %v831_v7  ;;  %v839_v21 = vrot.slane %v838_v27, 4  ;;  %v846_v41 = vrot.slane %v845_v0, 4 }
  0xd0   :  { %v800_v59 = vadd.f32 %v799_v18, %v798_v2  ;;  %v807_v37 = vadd.f32 %v806_v52, %v805_v12  ;;  %v813_v11 = vrot.slane %v812_v3, 2  ;;  %v820_v19 = vrot.slane %v819_v16, 2  ;;  %v3285_v18 = vld [vmem:[#allocation25_spill] sm:$0xff] }
  0xd1   :  { %v827_v5 = vrot.slane %v826_v44, 2  ;;  %v834_v43 = vrot.slane %v833_v26, 2  ;;  %v840_v48 = vadd.f32 %v839_v21, %v838_v27  ;;  %v847_v40 = vadd.f32 %v846_v41, %v845_v0  ;;  %v3286_v27 = vld [vmem:[#allocation26_spill] sm:$0xff]  ;;  %v3292_v41 = vld [vmem:[#allocation28_spill] sm:$0xff] }
  0xd2   :  { %v801_v6 = vrot.slane %v800_v59, 1  ;;  %v808_v8 = vrot.slane %v807_v37, 1  ;;  %v814_v50 = vadd.f32 %v813_v11, %v812_v3  ;;  %v821_v49 = vadd.f32 %v820_v19, %v819_v16  ;;  %v3293_v19 = vld [vmem:[#allocation29_spill] sm:$0xff] }
  0xd3   :  { %v828_v38 = vadd.f32 %v827_v5, %v826_v44  ;;  %v835_v32 = vadd.f32 %v834_v43, %v833_v26  ;;  %v841_v33 = vrot.slane %v840_v48, 2  ;;  %v848_v7 = vrot.slane %v847_v40, 2 }
  0xd4   :  { %v2457_v28 = vadd.f32 %v801_v6, %v800_v59  ;;  %v2459_v61 = vadd.f32 %v808_v8, %v807_v37  ;;  %v815_v2 = vrot.slane %v814_v50, 1  ;;  %v822_v12 = vrot.slane %v821_v49, 1 }
  0xd5   :  { %v829_v4 = vrot.slane %v828_v38, 1  ;;  %v836_v42 = vrot.slane %v835_v32, 1  ;;  %v842_v58 = vadd.f32 %v841_v33, %v840_v48  ;;  %v849_v46 = vadd.f32 %v848_v7, %v847_v40  ;;  %v3291_v48 = vld [vmem:[#allocation27_spill] sm:$0xff] }
  0xd6   :  { %v852_v52 = vsel %vm159_vm6, %v3285_v18, 0.0  ;;  %v859_v0 = vsel %vm159_vm6, %v3286_v27, 0.0  ;;  %v2465_v3 = vadd.f32 %v815_v2, %v814_v50  ;;  %v2467_v6 = vadd.f32 %v822_v12, %v821_v49 }
  0xd7   :  { %v2469_v8 = vadd.f32 %v829_v4, %v828_v38  ;;  %v2471_v16 = vadd.f32 %v836_v42, %v835_v32  ;;  %v843_v44 = vrot.slane %v842_v58, 1  ;;  %v850_v26 = vrot.slane %v849_v46, 1  ;;  %v3296_v42 = vld [vmem:[#allocation30_spill] sm:$0xff] }
  0xd8   :  { %3287 = vst [vmem:[#allocation23_spill] sm:$0xff] %v2465_v3  ;;  %v853_v59 = vrot.slane %v852_v52, 4  ;;  %v860_v37 = vrot.slane %v859_v0, 4  ;;  %v866_v40 = vsel %vm159_vm6, %v2169_v9, 0.0  ;;  %v873_v21 = vsel %vm169_vm7, %v3291_v48, 0.0 }
  0xd9   :  { %3288 = vst [vmem:[#allocation24_spill] sm:$0xff] %v2467_v6  ;;  %v880_v11 = vsel %vm159_vm6, %v3292_v41, 0.0  ;;  %v887_v49 = vsel %vm159_vm6, %v3293_v19, 0.0  ;;  %v2481_v38 = vadd.f32 %v843_v44, %v842_v58  ;;  %v2483_v5 = vadd.f32 %v850_v26, %v849_v46 }
  0xda   :  { %3289 = vst [vmem:[#allocation25_spill] sm:$0xff] %v2469_v8  ;;  %v854_v43 = vadd.f32 %v853_v59, %v852_v52  ;;  %v861_v50 = vadd.f32 %v860_v37, %v859_v0  ;;  %v867_v32 = vrot.slane %v866_v40, 4  ;;  %v874_v33 = vrot.slane %v873_v21, 4 }
  0xdb   :  { %3290 = vst [vmem:[#allocation26_spill] sm:$0xff] %v2471_v16  ;;  %v881_v7 = vrot.slane %v880_v11, 4  ;;  %v888_v2 = vrot.slane %v887_v49, 4  ;;  %v894_v4 = vsel %vm159_vm6, %v2190_v51, 0.0  ;;  %v901_v18 = vsel %vm169_vm7, %v3296_v42, 0.0 }
  0xdc   :  { %3294 = vst [vmem:[#allocation27_spill] sm:$0xff] %v2481_v38  ;;  %v855_v9 = vrot.slane %v854_v43, 2  ;;  %v862_v12 = vrot.slane %v861_v50, 2  ;;  %v868_v27 = vadd.f32 %v867_v32, %v866_v40  ;;  %v875_v48 = vadd.f32 %v874_v33, %v873_v21 }
  0xdd   :  { %3295 = vst [vmem:[#allocation28_spill] sm:$0xff] %v2483_v5  ;;  %v882_v58 = vadd.f32 %v881_v7, %v880_v11  ;;  %v889_v44 = vadd.f32 %v888_v2, %v887_v49  ;;  %v895_v52 = vrot.slane %v894_v4, 4  ;;  %v902_v0 = vrot.slane %v901_v18, 4 }
  0xde   :  { %v856_v46 = vadd.f32 %v855_v9, %v854_v43  ;;  %v863_v26 = vadd.f32 %v862_v12, %v861_v50  ;;  %v869_v59 = vrot.slane %v868_v27, 2  ;;  %v876_v37 = vrot.slane %v875_v48, 2  ;;  %v3298_v9 = vld [vmem:[#allocation31_spill] sm:$0xff] }
  0xdf   :  { %v883_v41 = vrot.slane %v882_v58, 2  ;;  %v890_v19 = vrot.slane %v889_v44, 2  ;;  %v896_v16 = vadd.f32 %v895_v52, %v894_v4  ;;  %v903_v8 = vadd.f32 %v902_v0, %v901_v18  ;;  %v3299_v4 = vld [vmem:[#allocation32_spill] sm:$0xff]  ;;  %v3305_v0 = vld [vmem:[#allocation34_spill] sm:$0xff] }
  0xe0   :  { %v857_v5 = vrot.slane %v856_v46, 1  ;;  %v864_v38 = vrot.slane %v863_v26, 1  ;;  %v870_v51 = vadd.f32 %v869_v59, %v868_v27  ;;  %v877_v6 = vadd.f32 %v876_v37, %v875_v48  ;;  %v3306_v37 = vld [vmem:[#allocation35_spill] sm:$0xff] }
  0xe1   :  { %v884_v3 = vadd.f32 %v883_v41, %v882_v58  ;;  %v891_v42 = vadd.f32 %v890_v19, %v889_v44  ;;  %v897_v11 = vrot.slane %v896_v16, 2  ;;  %v904_v49 = vrot.slane %v903_v8, 2 }
  0xe2   :  { %v2489_v40 = vadd.f32 %v857_v5, %v856_v46  ;;  %v2491_v21 = vadd.f32 %v864_v38, %v863_v26  ;;  %v871_v43 = vrot.slane %v870_v51, 1  ;;  %v878_v50 = vrot.slane %v877_v6, 1 }
  0xe3   :  { %v885_v32 = vrot.slane %v884_v3, 1  ;;  %v892_v33 = vrot.slane %v891_v42, 1  ;;  %v898_v7 = vadd.f32 %v897_v11, %v896_v16  ;;  %v905_v2 = vadd.f32 %v904_v49, %v903_v8  ;;  %v3304_v16 = vld [vmem:[#allocation33_spill] sm:$0xff] }
  0xe4   :  { %3297 = vst [vmem:[#allocation29_spill] sm:$0xff] %v2491_v21  ;;  %v908_v12 = vsel %vm159_vm6, %v3298_v9, 0.0  ;;  %v915_v18 = vsel %vm159_vm6, %v3299_v4, 0.0  ;;  %v2497_v27 = vadd.f32 %v871_v43, %v870_v51  ;;  %v2499_v5 = vadd.f32 %v878_v50, %v877_v6  ;;  %v3310_v9 = vld [vmem:[#allocation37_spill] sm:$0xff] }
  0xe5   :  { %v2501_v38 = vadd.f32 %v885_v32, %v884_v3  ;;  %v2503_v48 = vadd.f32 %v892_v33, %v891_v42  ;;  %v899_v58 = vrot.slane %v898_v7, 1  ;;  %v906_v44 = vrot.slane %v905_v2, 1  ;;  %v3309_v32 = vld [vmem:[#allocation36_spill] sm:$0xff] }
  0xe6   :  { %3300 = vst [vmem:[#allocation30_spill] sm:$0xff] %v2497_v27  ;;  %v909_v46 = vrot.slane %v908_v12, 4  ;;  %v916_v26 = vrot.slane %v915_v18, 4  ;;  %v922_v8 = vsel %vm159_vm6, %v2208_v63, 0.0  ;;  %v929_v52 = vsel %vm169_vm7, %v3304_v16, 0.0 }
  0xe7   :  { %3301 = vst [vmem:[#allocation31_spill] sm:$0xff] %v2499_v5  ;;  %v936_v59 = vsel %vm159_vm6, %v3305_v0, 0.0  ;;  %v943_v6 = vsel %vm159_vm6, %v3306_v37, 0.0  ;;  %v2513_v3 = vadd.f32 %v899_v58, %v898_v7  ;;  %v2515_v41 = vadd.f32 %v906_v44, %v905_v2 }
  0xe8   :  { %3302 = vst [vmem:[#allocation32_spill] sm:$0xff] %v2501_v38  ;;  %v910_v19 = vadd.f32 %v909_v46, %v908_v12  ;;  %v917_v51 = vadd.f32 %v916_v26, %v915_v18  ;;  %v923_v42 = vrot.slane %v922_v8, 4  ;;  %v930_v11 = vrot.slane %v929_v52, 4 }
  0xe9   :  { %3303 = vst [vmem:[#allocation50_spill] sm:$0xff] %v2503_v48  ;;  %v937_v49 = vrot.slane %v936_v59, 4  ;;  %v944_v43 = vrot.slane %v943_v6, 4  ;;  %v950_v33 = vsel %vm159_vm6, %v3309_v32, 0.0  ;;  %v957_v4 = vsel %vm169_vm7, %v3310_v9, 0.0 }
  0xea   :  { %3307 = vst [vmem:[#allocation33_spill] sm:$0xff] %v2513_v3  ;;  %v911_v63 = vrot.slane %v910_v19, 2  ;;  %v918_v50 = vrot.slane %v917_v51, 2  ;;  %v924_v16 = vadd.f32 %v923_v42, %v922_v8  ;;  %v931_v0 = vadd.f32 %v930_v11, %v929_v52 }
  0xeb   :  { %3308 = vst [vmem:[#allocation34_spill] sm:$0xff] %v2515_v41  ;;  %v938_v7 = vadd.f32 %v937_v49, %v936_v59  ;;  %v945_v58 = vadd.f32 %v944_v43, %v943_v6  ;;  %v951_v12 = vrot.slane %v950_v33, 4  ;;  %v958_v18 = vrot.slane %v957_v4, 4 }
  0xec   :  { %v912_v2 = vadd.f32 %v911_v63, %v910_v19  ;;  %v919_v44 = vadd.f32 %v918_v50, %v917_v51  ;;  %v925_v46 = vrot.slane %v924_v16, 2  ;;  %v932_v26 = vrot.slane %v931_v0, 2  ;;  %v3313_v63 = vld [vmem:[#allocation38_spill] sm:$0xff] }
  0xed   :  { %v939_v37 = vrot.slane %v938_v7, 2  ;;  %v946_v41 = vrot.slane %v945_v58, 2  ;;  %v952_v38 = vadd.f32 %v951_v12, %v950_v33  ;;  %v959_v5 = vadd.f32 %v958_v18, %v957_v4  ;;  %v3314_v33 = vld [vmem:[#allocation39_spill] sm:$0xff]  ;;  %v3321_v18 = vld [vmem:[#allocation42_spill] sm:$0xff] }
  0xee   :  { %v913_v3 = vrot.slane %v912_v2, 1  ;;  %v920_v48 = vrot.slane %v919_v44, 1  ;;  %v926_v32 = vadd.f32 %v925_v46, %v924_v16  ;;  %v933_v27 = vadd.f32 %v932_v26, %v931_v0  ;;  %v3322_v26 = vld [vmem:[#allocation43_spill] sm:$0xff] }
  0xef   :  { %v940_v21 = vadd.f32 %v939_v37, %v938_v7  ;;  %v947_v9 = vadd.f32 %v946_v41, %v945_v58  ;;  %v953_v59 = vrot.slane %v952_v38, 2  ;;  %v960_v6 = vrot.slane %v959_v5, 2 }
  0xf0   :  { %v2521_v8 = vadd.f32 %v913_v3, %v912_v2  ;;  %v2523_v52 = vadd.f32 %v920_v48, %v919_v44  ;;  %v927_v19 = vrot.slane %v926_v32, 1  ;;  %v934_v51 = vrot.slane %v933_v27, 1  ;;  %v3320_v44 = vld [vmem:[#allocation41_spill] sm:$0xff] }
  0xf1   :  { %v941_v42 = vrot.slane %v940_v21, 1  ;;  %v948_v11 = vrot.slane %v947_v9, 1  ;;  %v954_v49 = vadd.f32 %v953_v59, %v952_v38  ;;  %v961_v43 = vadd.f32 %v960_v6, %v959_v5  ;;  %v3319_v38 = vld [vmem:[#allocation40_spill] sm:$0xff] }
  0xf2   :  { %3311 = vst [vmem:[#allocation35_spill] sm:$0xff] %v2521_v8  ;;  %v964_v50 = vsel %vm159_vm6, %v3313_v63, 0.0  ;;  %v971_v4 = vsel %vm159_vm6, %v3314_v33, 0.0  ;;  %v2529_v16 = vadd.f32 %v927_v19, %v926_v32  ;;  %v2531_v3 = vadd.f32 %v934_v51, %v933_v27  ;;  %v3325_v63 = vld [vmem:[#allocation44_spill] sm:$0xff] }
  0xf3   :  { %3312 = vst [vmem:[#allocation36_spill] sm:$0xff] %v2523_v52  ;;  %v2533_v48 = vadd.f32 %v941_v42, %v940_v21  ;;  %v2535_v41 = vadd.f32 %v948_v11, %v947_v9  ;;  %v955_v0 = vrot.slane %v954_v49, 1  ;;  %v962_v7 = vrot.slane %v961_v43, 1 }
  0xf4   :  { %3315 = vst [vmem:[#allocation37_spill] sm:$0xff] %v2529_v16  ;;  %v965_v58 = vrot.slane %v964_v50, 4  ;;  %v972_v2 = vrot.slane %v971_v4, 4  ;;  %v978_v5 = vsel %vm159_vm6, %v3319_v38, 0.0  ;;  %v985_v12 = vsel %vm169_vm7, %v3320_v44, 0.0  ;;  %v3326_v38 = vld [vmem:[#allocation45_spill] sm:$0xff] }
  0xf5   :  { %3316 = vst [vmem:[#allocation38_spill] sm:$0xff] %v2531_v3  ;;  %v992_v46 = vsel %vm159_vm6, %v3321_v18, 0.0  ;;  %v999_v27 = vsel %vm159_vm6, %v3322_v26, 0.0  ;;  %v2545_v21 = vadd.f32 %v955_v0, %v954_v49  ;;  %v2547_v37 = vadd.f32 %v962_v7, %v961_v43 }
  0xf6   :  { %3317 = vst [vmem:[#allocation39_spill] sm:$0xff] %v2533_v48  ;;  %v966_v32 = vadd.f32 %v965_v58, %v964_v50  ;;  %v973_v9 = vadd.f32 %v972_v2, %v971_v4  ;;  %v979_v59 = vrot.slane %v978_v5, 4  ;;  %v986_v6 = vrot.slane %v985_v12, 4 }
  0xf7   :  { %3318 = vst [vmem:[#allocation51_spill] sm:$0xff] %v2535_v41  ;;  %v993_v19 = vrot.slane %v992_v46, 4  ;;  %v1000_v51 = vrot.slane %v999_v27, 4  ;;  %v1006_v33 = vsel %vm159_vm6, %v3325_v63, 0.0  ;;  %v1013_v44 = vsel %vm169_vm7, %v3326_v38, 0.0 }
  0xf8   :  { %3323 = vst [vmem:[#allocation40_spill] sm:$0xff] %v2545_v21  ;;  %v967_v42 = vrot.slane %v966_v32, 2  ;;  %v974_v11 = vrot.slane %v973_v9, 2  ;;  %v980_v18 = vadd.f32 %v979_v59, %v978_v5  ;;  %v987_v26 = vadd.f32 %v986_v6, %v985_v12 }
  0xf9   :  { %3324 = vst [vmem:[#allocation41_spill] sm:$0xff] %v2547_v37  ;;  %v994_v49 = vadd.f32 %v993_v19, %v992_v46  ;;  %v1001_v0 = vadd.f32 %v1000_v51, %v999_v27  ;;  %v1007_v50 = vrot.slane %v1006_v33, 4  ;;  %v1014_v4 = vrot.slane %v1013_v44, 4 }
  0xfa   :  { %v968_v43 = vadd.f32 %v967_v42, %v966_v32  ;;  %v975_v7 = vadd.f32 %v974_v11, %v973_v9  ;;  %v981_v58 = vrot.slane %v980_v18, 2  ;;  %v988_v2 = vrot.slane %v987_v26, 2  ;;  %v3327_v42 = vld [vmem:[#allocation2_spill] sm:$0xff] }
  0xfb   :  { %v995_v37 = vrot.slane %v994_v49, 2  ;;  %v1002_v21 = vrot.slane %v1001_v0, 2  ;;  %v1008_v3 = vadd.f32 %v1007_v50, %v1006_v33  ;;  %v1015_v16 = vadd.f32 %v1014_v4, %v1013_v44  ;;  %v3328_v33 = vld [vmem:[#allocation3_spill] sm:$0xff] }
  0xfc   :  { %v969_v41 = vrot.slane %v968_v43, 1  ;;  %v976_v48 = vrot.slane %v975_v7, 1  ;;  %v982_v63 = vadd.f32 %v981_v58, %v980_v18  ;;  %v989_v52 = vadd.f32 %v988_v2, %v987_v26 }
  0xfd   :  { %v996_v8 = vadd.f32 %v995_v37, %v994_v49  ;;  %v1003_v38 = vadd.f32 %v1002_v21, %v1001_v0  ;;  %v1009_v46 = vrot.slane %v1008_v3, 2  ;;  %v1016_v27 = vrot.slane %v1015_v16, 2  ;;  %v3329_v49 = vld [vmem:[#allocation4_spill] sm:$0xff] }
  0xfe   :  { %v2553_v5 = vadd.f32 %v969_v41, %v968_v43  ;;  %v2555_v12 = vadd.f32 %v976_v48, %v975_v7  ;;  %v983_v32 = vrot.slane %v982_v63, 1  ;;  %v990_v9 = vrot.slane %v989_v52, 1 }
  0xff   :  { %v997_v59 = vrot.slane %v996_v8, 1  ;;  %v1004_v6 = vrot.slane %v1003_v38, 1  ;;  %v1010_v19 = vadd.f32 %v1009_v46, %v1008_v3  ;;  %v1017_v51 = vadd.f32 %v1016_v27, %v1015_v16  ;;  %v3330_v16 = vld [vmem:[#allocation5_spill] sm:$0xff] }
 0x100   :  { %v2558_v11 = vrot.slane %v3327_v42, 1  ;;  %v2561_v44 = vrot.slane %v3328_v33, 1  ;;  %v2563_v37 = vadd.f32 %v983_v32, %v982_v63  ;;  %v2565_v41 = vadd.f32 %v990_v9, %v989_v52 }
 0x101   :  { %v2567_v48 = vadd.f32 %v997_v59, %v996_v8  ;;  %v2569_v21 = vadd.f32 %v1004_v6, %v1003_v38  ;;  %v1011_v18 = vrot.slane %v1010_v19, 1  ;;  %v1018_v26 = vrot.slane %v1017_v51, 1 }
 0x102   :  { %v2572_v0 = vrot.slane %v3329_v49, 1  ;;  %v2575_v3 = vrot.slane %v3330_v16, 1  ;;  %v2578_v43 = vrot.slane %v3327_v42, 2  ;;  %v2581_v7 = vrot.slane %v3328_v33, 2 }
 0x103   :  { %v2584_v52 = vrot.slane %v3329_v49, 2  ;;  %v2587_v8 = vrot.slane %v3330_v16, 2  ;;  %v2589_v50 = vadd.f32 %v1011_v18, %v1010_v19  ;;  %v2591_v4 = vadd.f32 %v1018_v26, %v1017_v51  ;;  %v3333_v26 = vld [vmem:[#allocation46_spill] sm:$0xff] }
 0x104   :  { %v2594_v58 = vrot.slane %v3327_v42, 3  ;;  %v2597_v2 = vrot.slane %v3328_v33, 3  ;;  %v2600_v63 = vrot.slane %v3329_v49, 3  ;;  %v2603_v38 = vrot.slane %v3330_v16, 3 }
 0x105   :  { %v2606_v46 = vrot.slane %v3327_v42, 4  ;;  %v2609_v27 = vrot.slane %v3328_v33, 4  ;;  %v2612_v32 = vrot.slane %v3329_v49, 4  ;;  %v2615_v9 = vrot.slane %v3330_v16, 4 }
 0x106   :  { %v2619_v59 = vmul.f32 %v2265_v14, %v3327_v42  ;;  %v2623_v6 = vmul.f32 %v2267_v20, %v3328_v33  ;;  %v2627_v19 = vmul.f32 %v2269_v34, %v3329_v49  ;;  %v2631_v51 = vmul.f32 %v2271_v57, %v3330_v16 }
 0x107   :  { %v2635_v18 = vmul.f32 %v2558_v11, %v2273_v45  ;;  %v2639_v14 = vmul.f32 %v2561_v44, %v2275_v1  ;;  %v2643_v20 = vmul.f32 %v2572_v0, %v3333_v26  ;;  %v2651_v57 = vmul.f32 %v2578_v43, %v2297_v54 }
 0x108   :  { %3331 = vst [vmem:[#allocation42_spill] sm:$0xff] %v2623_v6  ;;  %v3334_v6 = vld [vmem:[#allocation47_spill] sm:$0xff]  ;;  %v2655_v45 = vmul.f32 %v2581_v7, %v2299_v53  ;;  %v2659_v1 = vmul.f32 %v2584_v52, %v2305_v35  ;;  %v2663_v26 = vmul.f32 %v2587_v8, %v2307_v23  ;;  %v2671_v54 = vmul.f32 %v2597_v2, %v2311_v39 }
 0x109   :  { %3332 = vst [vmem:[#allocation43_spill] sm:$0xff] %v2631_v51  ;;  %v2647_v34 = vmul.f32 %v2575_v3, %v3334_v6  ;;  %v2667_v6 = vmul.f32 %v2594_v58, %v2309_v30  ;;  %v2675_v53 = vmul.f32 %v2600_v63, %v2321_v17  ;;  %v2679_v35 = vmul.f32 %v2603_v38, %v2323_v13  ;;  %v3338_v51 = vld [vmem:[#allocation48_spill] sm:$0xff] }
 0x10a   :  { %v2683_v23 = vmul.f32 %v2606_v46, %v2329_v25  ;;  %v2687_v30 = vmul.f32 %v2609_v27, %v2331_v47  ;;  %v2691_v39 = vmul.f32 %v2612_v32, %v2337_v29  ;;  %v2695_v17 = vmul.f32 %v2615_v9, %v2339_v55 }
 0x10b   :  { %v2699_v13 = vmul.f32 %v2341_v10, %v3327_v42  ;;  %v2703_v25 = vmul.f32 %v2343_v56, %v3328_v33  ;;  %v2707_v47 = vmul.f32 %v2353_v24, %v3329_v49  ;;  %v2711_v29 = vmul.f32 %v3338_v51, %v3330_v16 }
 0x10c   :  { %v2715_v55 = vmul.f32 %v2558_v11, %v2361_v22  ;;  %v2719_v10 = vmul.f32 %v2561_v44, %v2363_v62 }
 0x10d   :  { %3335 = vst [vmem:[#allocation44_spill] sm:$0xff] %v2699_v13  ;;  %v3342_v13 = vld [vmem:[#allocation8_spill] sm:$0xff] }
 0x10e   :  { %3336 = vst [vmem:[#allocation45_spill] sm:$0xff] %v2703_v25  ;;  %v2723_v56 = vmul.f32 %v2572_v0, %v3342_v13  ;;  %v3344_v25 = vld [vmem:[#allocation6_spill] sm:$0xff] }
 0x10f   :  { %3337 = vst [vmem:[#allocation2_spill] sm:$0xff] %v2707_v47  ;;  %v2727_v24 = vmul.f32 %v2575_v3, %v3344_v25  ;;  %v3346_v47 = vld [vmem:[#allocation7_spill] sm:$0xff]  ;;  %v2747_v25 = vmul.f32 %v2594_v58, %v2393_v15 }
 0x110   :  { %3339 = vst [vmem:[#allocation3_spill] sm:$0xff] %v2711_v29  ;;  %v2731_v51 = vmul.f32 %v2578_v43, %v3346_v47  ;;  %v3347_v29 = vld [vmem:[#allocation49_spill] sm:$0xff]  ;;  %v2751_v47 = vmul.f32 %v2597_v2, %v2395_v36 }
 0x111   :  { %3340 = vst [vmem:[#allocation4_spill] sm:$0xff] %v2715_v55  ;;  %v2735_v22 = vmul.f32 %v2581_v7, %v3347_v29  ;;  %v3349_v55 = vld [vmem:[#allocation9_spill] sm:$0xff] }
 0x112   :  { %3341 = vst [vmem:[#allocation5_spill] sm:$0xff] %v2719_v10  ;;  %v2739_v62 = vmul.f32 %v2584_v52, %v3349_v55  ;;  %v3351_v10 = vld [vmem:[#allocation10_spill] sm:$0xff] }
 0x113   :  { %3343 = vst [vmem:[#allocation46_spill] sm:$0xff] %v2723_v56  ;;  %v2743_v13 = vmul.f32 %v2587_v8, %v3351_v10  ;;  %v3356_v56 = vld [vmem:[#allocation12_spill] sm:$0xff] }
 0x114   :  { %3345 = vst [vmem:[#allocation47_spill] sm:$0xff] %v2727_v24  ;;  %v3354_v24 = vld [vmem:[#allocation11_spill] sm:$0xff]  ;;  %v2759_v55 = vmul.f32 %v2603_v38, %v3356_v56  ;;  %v2779_v56 = vmul.f32 %v2425_v31, %v3327_v42 }
 0x115   :  { %3348 = vst [vmem:[#allocation48_spill] sm:$0xff] %v2735_v22  ;;  %v2755_v29 = vmul.f32 %v2600_v63, %v3354_v24  ;;  %v3360_v22 = vld [vmem:[#allocation15_spill] sm:$0xff] }
 0x116   :  { %3350 = vst [vmem:[#allocation8_spill] sm:$0xff] %v2739_v62  ;;  %v3358_v62 = vld [vmem:[#allocation13_spill] sm:$0xff]  ;;  %v2771_v36 = vmul.f32 %v2612_v32, %v3360_v22 }
 0x117   :  { %3352 = vst [vmem:[#allocation6_spill] sm:$0xff] %v2743_v13  ;;  %v2763_v10 = vmul.f32 %v2606_v46, %v3358_v62  ;;  %v3359_v13 = vld [vmem:[#allocation14_spill] sm:$0xff]  ;;  %v2783_v62 = vmul.f32 %v2427_v60, %v3328_v33 }
 0x118   :  { %3353 = vst [vmem:[#allocation7_spill] sm:$0xff] %v2751_v47  ;;  %v2767_v15 = vmul.f32 %v2609_v27, %v3359_v13  ;;  %v3362_v47 = vld [vmem:[#allocation16_spill] sm:$0xff] }
 0x119   :  { %3355 = vst [vmem:[#allocation49_spill] sm:$0xff] %v2755_v29  ;;  %v2775_v24 = vmul.f32 %v2615_v9, %v3362_v47  ;;  %v3368_v29 = vld [vmem:[#allocation18_spill] sm:$0xff] }
 0x11a   :  { %3357 = vst [vmem:[#allocation9_spill] sm:$0xff] %v2759_v55  ;;  %v3366_v55 = vld [vmem:[#allocation17_spill] sm:$0xff]  ;;  %v2791_v22 = vmul.f32 %v3368_v29, %v3330_v16  ;;  %v2811_v29 = vmul.f32 %v2578_v43, %v2457_v28 }
 0x11b   :  { %3361 = vst [vmem:[#allocation10_spill] sm:$0xff] %v2771_v36  ;;  %v2787_v13 = vmul.f32 %v3366_v55, %v3329_v49  ;;  %v3370_v36 = vld [vmem:[#allocation19_spill] sm:$0xff] }
 0x11c   :  { %3363 = vst [vmem:[#allocation11_spill] sm:$0xff] %v2775_v24  ;;  %v2795_v47 = vmul.f32 %v2558_v11, %v3370_v36  ;;  %v3371_v24 = vld [vmem:[#allocation20_spill] sm:$0xff]  ;;  %v2815_v36 = vmul.f32 %v2581_v7, %v2459_v61 }
 0x11d   :  { %3364 = vst [vmem:[#allocation12_spill] sm:$0xff] %v2779_v56  ;;  %v2799_v31 = vmul.f32 %v2561_v44, %v3371_v24  ;;  %v3373_v56 = vld [vmem:[#allocation21_spill] sm:$0xff] }
 0x11e   :  { %3365 = vst [vmem:[#allocation13_spill] sm:$0xff] %v2783_v62  ;;  %v2803_v60 = vmul.f32 %v2572_v0, %v3373_v56  ;;  %v3375_v62 = vld [vmem:[#allocation22_spill] sm:$0xff] }
 0x11f   :  { %3367 = vst [vmem:[#allocation14_spill] sm:$0xff] %v2787_v13  ;;  %v2807_v55 = vmul.f32 %v2575_v3, %v3375_v62  ;;  %v3380_v13 = vld [vmem:[#allocation24_spill] sm:$0xff] }
 0x120   :  { %3369 = vst [vmem:[#allocation15_spill] sm:$0xff] %v2791_v22  ;;  %v3378_v22 = vld [vmem:[#allocation23_spill] sm:$0xff]  ;;  %v2823_v56 = vmul.f32 %v2587_v8, %v3380_v13  ;;  %v2843_v13 = vmul.f32 %v2606_v46, %v2489_v40 }
 0x121   :  { %3372 = vst [vmem:[#allocation16_spill] sm:$0xff] %v2799_v31  ;;  %v2819_v24 = vmul.f32 %v2584_v52, %v3378_v22  ;;  %v3385_v31 = vld [vmem:[#allocation27_spill] sm:$0xff] }
 0x122   :  { %3374 = vst [vmem:[#allocation17_spill] sm:$0xff] %v2803_v60  ;;  %v3382_v60 = vld [vmem:[#allocation25_spill] sm:$0xff]  ;;  %v2835_v61 = vmul.f32 %v2600_v63, %v3385_v31 }
 0x123   :  { %3376 = vst [vmem:[#allocation18_spill] sm:$0xff] %v2807_v55  ;;  %v2827_v62 = vmul.f32 %v2594_v58, %v3382_v60  ;;  %v3383_v55 = vld [vmem:[#allocation26_spill] sm:$0xff] }
 0x124   :  { %3377 = vst [vmem:[#allocation19_spill] sm:$0xff] %v2815_v36  ;;  %v2831_v28 = vmul.f32 %v2597_v2, %v3383_v55  ;;  %v3387_v36 = vld [vmem:[#allocation28_spill] sm:$0xff] }
 0x125   :  { %3379 = vst [vmem:[#allocation20_spill] sm:$0xff] %v2819_v24  ;;  %v2839_v22 = vmul.f32 %v2603_v38, %v3387_v36  ;;  %v3392_v24 = vld [vmem:[#allocation30_spill] sm:$0xff] }
 0x126   :  { %3381 = vst [vmem:[#allocation21_spill] sm:$0xff] %v2823_v56  ;;  %v3390_v56 = vld [vmem:[#allocation29_spill] sm:$0xff]  ;;  %v2851_v55 = vmul.f32 %v2612_v32, %v3392_v24 }
 0x127   :  { %3384 = vst [vmem:[#allocation22_spill] sm:$0xff] %v2831_v28  ;;  %v2847_v60 = vmul.f32 %v2609_v27, %v3390_v56  ;;  %v3394_v28 = vld [vmem:[#allocation31_spill] sm:$0xff] }
 0x128   :  { %3386 = vst [vmem:[#allocation23_spill] sm:$0xff] %v2835_v61  ;;  %v2855_v31 = vmul.f32 %v2615_v9, %v3394_v28  ;;  %v3396_v61 = vld [vmem:[#allocation32_spill] sm:$0xff] }
 0x129   :  { %3388 = vst [vmem:[#allocation24_spill] sm:$0xff] %v2839_v22  ;;  %v2859_v36 = vmul.f32 %v3396_v61, %v3327_v42  ;;  %v3397_v22 = vld [vmem:[#allocation50_spill] sm:$0xff]  ;;  %v3402_v61 = vld [vmem:[#allocation37_spill] sm:$0xff] }
 0x12a   :  { %3389 = vst [vmem:[#allocation25_spill] sm:$0xff] %v2843_v13  ;;  %v2863_v40 = vmul.f32 %v3397_v22, %v3328_v33  ;;  %v3398_v13 = vld [vmem:[#allocation33_spill] sm:$0xff]  ;;  %v2883_v33 = vmul.f32 %v2572_v0, %v3402_v61  ;;  %v3403_v22 = vld [vmem:[#allocation38_spill] sm:$0xff]  ;;  %v1247_v61 = vrot.slane %v2663_v26, 6  ;;  %v1257_v26 = vrot.slane %v2747_v25, 5 }
 0x12b   :  { %3391 = vst [vmem:[#allocation26_spill] sm:$0xff] %v2847_v60  ;;  %v2867_v56 = vmul.f32 %v3398_v13, %v3329_v49  ;;  %v3399_v60 = vld [vmem:[#allocation34_spill] sm:$0xff]  ;;  %v2887_v49 = vmul.f32 %v2575_v3, %v3403_v22  ;;  %v3404_v13 = vld [vmem:[#allocation39_spill] sm:$0xff]  ;;  %v2907_v3 = vmul.f32 %v2594_v58, %v2553_v5  ;;  %v2927_v5 = vmul.f32 %v2609_v27, %v2569_v21 }
 0x12c   :  { %3393 = vst [vmem:[#allocation27_spill] sm:$0xff] %v2851_v55  ;;  %v2871_v24 = vmul.f32 %v3399_v60, %v3330_v16  ;;  %v3400_v55 = vld [vmem:[#allocation35_spill] sm:$0xff]  ;;  %v2891_v16 = vmul.f32 %v2578_v43, %v3404_v13  ;;  %v2911_v43 = vmul.f32 %v2597_v2, %v2555_v12  ;;  %v2931_v12 = vmul.f32 %v2612_v32, %v2589_v50  ;;  %v3408_v27 = vld [vmem:[#allocation42_spill] sm:$0xff] }
 0x12d   :  { %3395 = vst [vmem:[#allocation28_spill] sm:$0xff] %v2855_v31  ;;  %v2875_v28 = vmul.f32 %v2558_v11, %v3400_v55  ;;  %v3401_v31 = vld [vmem:[#allocation36_spill] sm:$0xff]  ;;  %v3405_v60 = vld [vmem:[#allocation51_spill] sm:$0xff]  ;;  %v1220_v58 = vrot.slane %v2635_v18, 7  ;;  %v1224_v2 = vrot.slane %v2667_v6, 5  ;;  %v1229_v21 = vrot.slane %v2639_v14, 7 }
 0x12e   :  { %v2879_v42 = vmul.f32 %v2561_v44, %v3401_v31  ;;  %v2895_v11 = vmul.f32 %v2581_v7, %v3405_v60  ;;  %v3406_v55 = vld [vmem:[#allocation40_spill] sm:$0xff]  ;;  %v3407_v31 = vld [vmem:[#allocation41_spill] sm:$0xff]  ;;  %v2915_v7 = vmul.f32 %v2600_v63, %v2563_v37  ;;  %v2935_v37 = vmul.f32 %v2615_v9, %v2591_v4  ;;  %v3409_v22 = vld [vmem:[#allocation43_spill] sm:$0xff] }
 0x12f   :  { %v2899_v44 = vmul.f32 %v2584_v52, %v3406_v55  ;;  %v2903_v0 = vmul.f32 %v2587_v8, %v3407_v31  ;;  %v2919_v52 = vmul.f32 %v2603_v38, %v2565_v41  ;;  %v2923_v8 = vmul.f32 %v2606_v46, %v2567_v48  ;;  %v3410_v55 = vld [vmem:[#allocation4_spill] sm:$0xff] }
 0x130   :  { %v1222_v41 = vrot.slane %v2651_v57, 6  ;;  %v1226_v48 = vrot.slane %v2683_v23, 4  ;;  %v1221_v63 = vsel %vm128_vm3, %v1220_v58, %v2619_v59  ;;  %v1231_v50 = vrot.slane %v2655_v45, 6 }
 0x131   :  { %v1233_v38 = vrot.slane %v2671_v54, 5  ;;  %v1235_v4 = vrot.slane %v2687_v30, 4  ;;  %v1230_v32 = vsel %vm128_vm3, %v1229_v21, %v3408_v27  ;;  %v1237_v9 = vrot.slane %v2643_v20, 7  ;;  %v3412_v21 = vld [vmem:[#allocation5_spill] sm:$0xff] }
 0x132   :  { %v1223_v46 = vsel %vm124_vm1, %v1222_v41, %v1221_v63  ;;  %v1239_v18 = vrot.slane %v2659_v1, 6  ;;  %v1232_v57 = vsel %vm124_vm1, %v1231_v50, %v1230_v32  ;;  %v1241_v59 = vrot.slane %v2675_v53, 5  ;;  %v3411_v41 = vld [vmem:[#allocation44_spill] sm:$0xff]  ;;  %v3415_v27 = vld [vmem:[#allocation45_spill] sm:$0xff] }
 0x133   :  { %v1225_v14 = vsel %vm130_vm4, %v1224_v2, %v1223_v46  ;;  %v1243_v45 = vrot.slane %v2691_v39, 4  ;;  %v1234_v54 = vsel %vm130_vm4, %v1233_v38, %v1232_v57  ;;  %v1238_v23 = vsel %vm128_vm3, %v1237_v9, %v2627_v19  ;;  %v3413_v38 = vld [vmem:[#allocation48_spill] sm:$0xff]  ;;  %v3414_v46 = vld [vmem:[#allocation7_spill] sm:$0xff] }
 0x134   :  { %v2957_v6 = vsel %vm1227_vm8, %v1226_v48, %v1225_v14  ;;  %v1245_v20 = vrot.slane %v2647_v34, 7  ;;  %v2964_v1 = vsel %vm1227_vm8, %v1235_v4, %v1234_v54  ;;  %v1240_v30 = vsel %vm124_vm1, %v1239_v18, %v1238_v23  ;;  %v3416_v18 = vld [vmem:[#allocation46_spill] sm:$0xff]  ;;  %v3418_v54 = vld [vmem:[#allocation49_spill] sm:$0xff] }
 0x135   :  { %v1249_v53 = vrot.slane %v2679_v35, 5  ;;  %v1242_v39 = vsel %vm130_vm4, %v1241_v59, %v1240_v30  ;;  %v1251_v60 = vrot.slane %v2695_v17, 4  ;;  %v1253_v19 = vrot.slane %v3410_v55, 7  ;;  %v3417_v59 = vld [vmem:[#allocation8_spill] sm:$0xff]  ;;  %v3419_v30 = vld [vmem:[#allocation2_spill] sm:$0xff] }
 0x136   :  { %v1246_v13 = vsel %vm128_vm3, %v1245_v20, %v3409_v22  ;;  %v2975_v34 = vsel %vm1227_vm8, %v1243_v45, %v1242_v39  ;;  %v1255_v58 = vrot.slane %v2731_v51, 6  ;;  %v1259_v48 = vrot.slane %v2763_v10, 4  ;;  %v3421_v22 = vld [vmem:[#allocation47_spill] sm:$0xff]  ;;  %v3422_v55 = vld [vmem:[#allocation6_spill] sm:$0xff] }
 0x137   :  { %v1248_v31 = vsel %vm124_vm1, %v1247_v61, %v1246_v13  ;;  %v1254_v2 = vsel %vm128_vm3, %v1253_v19, %v3411_v41  ;;  %v1261_v17 = vrot.slane %v3412_v21, 7  ;;  %v1263_v4 = vrot.slane %v3413_v38, 6 }
 0x138   :  { %v1250_v35 = vsel %vm130_vm4, %v1249_v53, %v1248_v31  ;;  %v1256_v50 = vsel %vm124_vm1, %v1255_v58, %v1254_v2  ;;  %v1265_v51 = vrot.slane %v3414_v46, 5  ;;  %v1267_v9 = vrot.slane %v2767_v15, 4  ;;  %v3420_v53 = vld [vmem:[#allocation10_spill] sm:$0xff]  ;;  %v3423_v31 = vld [vmem:[#allocation9_spill] sm:$0xff]  ;;  %v3425_v2 = vld [vmem:[#allocation11_spill] sm:$0xff] }
 0x139   :  { %v2986_v63 = vsel %vm1227_vm8, %v1251_v60, %v1250_v35  ;;  %v1258_v25 = vsel %vm130_vm4, %v1257_v26, %v1256_v50  ;;  %v1262_v32 = vsel %vm128_vm3, %v1261_v17, %v3415_v27  ;;  %v1269_v10 = vrot.slane %v3416_v18, 7  ;;  %v3424_v35 = vld [vmem:[#allocation3_spill] sm:$0xff]  ;;  %v3427_v27 = vld [vmem:[#allocation25_spill] sm:$0xff] }
 0x13a   :  { %v2997_v14 = vsel %vm1227_vm8, %v1259_v48, %v1258_v25  ;;  %v1264_v57 = vsel %vm124_vm1, %v1263_v4, %v1262_v32  ;;  %v1271_v45 = vrot.slane %v3417_v59, 6  ;;  %v1273_v23 = vrot.slane %v3418_v54, 5  ;;  %v3431_v54 = vld [vmem:[#allocation13_spill] sm:$0xff] }
 0x13b   :  { %v1266_v20 = vsel %vm130_vm4, %v1265_v51, %v1264_v57  ;;  %v1270_v61 = vsel %vm128_vm3, %v1269_v10, %v3419_v30  ;;  %v1275_v39 = vrot.slane %v3420_v53, 4  ;;  %v1277_v15 = vrot.slane %v3421_v22, 7  ;;  %v3426_v51 = vld [vmem:[#allocation12_spill] sm:$0xff]  ;;  %v3429_v57 = vld [vmem:[#allocation19_spill] sm:$0xff] }
 0x13c   :  { %v3008_v13 = vsel %vm1227_vm8, %v1267_v9, %v1266_v20  ;;  %v1272_v60 = vsel %vm124_vm1, %v1271_v45, %v1270_v61  ;;  %v1279_v19 = vrot.slane %v3422_v55, 6  ;;  %v1281_v58 = vrot.slane %v3423_v31, 5  ;;  %v3428_v9 = vld [vmem:[#allocation16_spill] sm:$0xff]  ;;  %v3430_v45 = vld [vmem:[#allocation22_spill] sm:$0xff]  ;;  %v3433_v61 = vld [vmem:[#allocation17_spill] sm:$0xff] }
 0x13d   :  { %v1274_v26 = vsel %vm130_vm4, %v1273_v23, %v1272_v60  ;;  %v1278_v41 = vsel %vm128_vm3, %v1277_v15, %v3424_v35  ;;  %v1283_v48 = vrot.slane %v3425_v2, 4  ;;  %v1285_v21 = vrot.slane %v2795_v47, 7  ;;  %v3432_v20 = vld [vmem:[#allocation26_spill] sm:$0xff]  ;;  %v3434_v15 = vld [vmem:[#allocation20_spill] sm:$0xff]  ;;  %v3435_v55 = vld [vmem:[#allocation23_spill] sm:$0xff] }
 0x13e   :  { %v3019_v17 = vsel %vm1227_vm8, %v1275_v39, %v1274_v26  ;;  %v1280_v50 = vsel %vm124_vm1, %v1279_v19, %v1278_v41  ;;  %v1287_v38 = vrot.slane %v2811_v29, 6  ;;  %v1289_v4 = vrot.slane %v2827_v62, 5  ;;  %v3437_v35 = vld [vmem:[#allocation27_spill] sm:$0xff]  ;;  %v3438_v2 = vld [vmem:[#allocation18_spill] sm:$0xff] }
 0x13f   :  { %v1282_v46 = vsel %vm130_vm4, %v1281_v58, %v1280_v50  ;;  %v1286_v25 = vsel %vm128_vm3, %v1285_v21, %v3426_v51  ;;  %v1291_v32 = vrot.slane %v3427_v27, 4  ;;  %v1293_v18 = vrot.slane %v3428_v9, 7  ;;  %v3436_v58 = vld [vmem:[#allocation14_spill] sm:$0xff]  ;;  %v3441_v27 = vld [vmem:[#allocation15_spill] sm:$0xff]  ;;  %v3442_v9 = vld [vmem:[#allocation28_spill] sm:$0xff] }
 0x140   :  { %v3030_v47 = vsel %vm1227_vm8, %v1283_v48, %v1282_v46  ;;  %v1288_v10 = vsel %vm124_vm1, %v1287_v38, %v1286_v25  ;;  %v1295_v59 = vrot.slane %v3429_v57, 6  ;;  %v1297_v29 = vrot.slane %v3430_v45, 5  ;;  %v3439_v38 = vld [vmem:[#allocation21_spill] sm:$0xff]  ;;  %v3440_v46 = vld [vmem:[#allocation24_spill] sm:$0xff] }
 0x141   :  { %v1290_v62 = vsel %vm130_vm4, %v1289_v4, %v1288_v10  ;;  %v1294_v23 = vsel %vm128_vm3, %v1293_v18, %v3431_v54  ;;  %v1299_v30 = vrot.slane %v3432_v20, 4  ;;  %v1301_v53 = vrot.slane %v3433_v61, 7 }
 0x142   :  { %v3041_v39 = vsel %vm1227_vm8, %v1291_v32, %v1290_v62  ;;  %v1296_v22 = vsel %vm124_vm1, %v1295_v59, %v1294_v23  ;;  %v1303_v60 = vrot.slane %v3434_v15, 6  ;;  %v1305_v19 = vrot.slane %v3435_v55, 5 }
 0x143   :  { %v1298_v31 = vsel %vm130_vm4, %v1297_v29, %v1296_v22  ;;  %v1302_v26 = vsel %vm128_vm3, %v1301_v53, %v3436_v58  ;;  %v1307_v41 = vrot.slane %v3437_v35, 4  ;;  %v1309_v48 = vrot.slane %v3438_v2, 7 }
 0x144   :  { %v3052_v21 = vsel %vm1227_vm8, %v1299_v30, %v1298_v31  ;;  %v1304_v50 = vsel %vm124_vm1, %v1303_v60, %v1302_v26  ;;  %v1311_v4 = vrot.slane %v3439_v38, 6  ;;  %v1313_v51 = vrot.slane %v3440_v46, 5 }
 0x145   :  { %v1306_v25 = vsel %vm130_vm4, %v1305_v19, %v1304_v50  ;;  %v1310_v32 = vsel %vm128_vm3, %v1309_v48, %v3441_v27  ;;  %v1315_v18 = vrot.slane %v3442_v9, 4  ;;  %v1317_v10 = vrot.slane %v2875_v28, 7 }
 0x146   :  { %v3063_v57 = vsel %vm1227_vm8, %v1307_v41, %v1306_v25  ;;  %v1312_v59 = vsel %vm124_vm1, %v1311_v4, %v1310_v32  ;;  %v1319_v45 = vrot.slane %v2891_v16, 6  ;;  %v1321_v29 = vrot.slane %v2907_v3, 5 }
 0x147   :  { %v1314_v62 = vsel %vm130_vm4, %v1313_v51, %v1312_v59  ;;  %v1318_v54 = vsel %vm128_vm3, %v1317_v10, %v2859_v36  ;;  %v1323_v23 = vrot.slane %v2923_v8, 4  ;;  %v1325_v20 = vrot.slane %v2879_v42, 7 }
 0x148   :  { %v3074_v28 = vsel %vm1227_vm8, %v1315_v18, %v1314_v62  ;;  %v1320_v30 = vsel %vm124_vm1, %v1319_v45, %v1318_v54  ;;  %v1327_v61 = vrot.slane %v2895_v11, 6  ;;  %v1329_v16 = vrot.slane %v2911_v43, 5 }
 0x149   :  { %v1322_v3 = vsel %vm130_vm4, %v1321_v29, %v1320_v30  ;;  %v1326_v53 = vsel %vm128_vm3, %v1325_v20, %v2863_v40  ;;  %v1331_v36 = vrot.slane %v2927_v5, 4  ;;  %v1333_v8 = vrot.slane %v2883_v33, 7 }
 0x14a   :  { %v3085_v42 = vsel %vm1227_vm8, %v1323_v23, %v1322_v3  ;;  %v1328_v22 = vsel %vm124_vm1, %v1327_v61, %v1326_v53  ;;  %v1335_v15 = vrot.slane %v2899_v44, 6  ;;  %v1337_v11 = vrot.slane %v2915_v7, 5 }
 0x14b   :  { %v1330_v43 = vsel %vm130_vm4, %v1329_v16, %v1328_v22  ;;  %v1334_v60 = vsel %vm128_vm3, %v1333_v8, %v2867_v56  ;;  %v1339_v40 = vrot.slane %v2931_v12, 4  ;;  %v1341_v5 = vrot.slane %v2887_v49, 7 }
 0x14c   :  { %v3096_v33 = vsel %vm1227_vm8, %v1331_v36, %v1330_v43  ;;  %v1336_v55 = vsel %vm124_vm1, %v1335_v15, %v1334_v60  ;;  %v1343_v19 = vrot.slane %v2903_v0, 6  ;;  %v1345_v44 = vrot.slane %v2919_v52, 5 }
 0x14d   :  { %v1338_v7 = vsel %vm130_vm4, %v1337_v11, %v1336_v55  ;;  %v1342_v31 = vsel %vm128_vm3, %v1341_v5, %v2871_v24  ;;  %v1347_v56 = vrot.slane %v2935_v37, 4  ;;  %v1365_v12 = vsel %vm159_vm6, %v2957_v6, 0.0 }
 0x14e   :  { %v3108_v49 = vsel %vm1227_vm8, %v1339_v40, %v1338_v7  ;;  %v1344_v58 = vsel %vm124_vm1, %v1343_v19, %v1342_v31  ;;  %v1366_v26 = vrot.slane %v1365_v12, 4  ;;  %v1372_v0 = vsel %vm159_vm6, %v2964_v1, 0.0 }
 0x14f   :  { %v1346_v52 = vsel %vm130_vm4, %v1345_v44, %v1344_v58  ;;  %v1373_v35 = vrot.slane %v1372_v0, 4  ;;  %v1379_v24 = vsel %vm159_vm6, %v2975_v34, 0.0  ;;  %v1386_v37 = vsel %vm169_vm7, %v2986_v63, 0.0 }
 0x150   :  { %v3119_v6 = vsel %vm1227_vm8, %v1347_v56, %v1346_v52  ;;  %v1367_v41 = vadd.f32 %v1366_v26, %v1365_v12  ;;  %v1380_v2 = vrot.slane %v1379_v24, 4  ;;  %v1387_v48 = vrot.slane %v1386_v37, 4 }
 0x151   :  { %v1374_v50 = vadd.f32 %v1373_v35, %v1372_v0  ;;  %v1393_v38 = vsel %vm159_vm6, %v2997_v14, 0.0  ;;  %v1400_v1 = vsel %vm159_vm6, %v3008_v13, 0.0  ;;  %v1407_v4 = vsel %vm159_vm6, %v3019_v17, 0.0 }
 0x152   :  { %v1368_v34 = vrot.slane %v1367_v41, 2  ;;  %v1381_v46 = vadd.f32 %v1380_v2, %v1379_v24  ;;  %v1388_v51 = vadd.f32 %v1387_v48, %v1386_v37  ;;  %v1394_v63 = vrot.slane %v1393_v38, 4 }
 0x153   :  { %v1375_v25 = vrot.slane %v1374_v50, 2  ;;  %v1401_v27 = vrot.slane %v1400_v1, 4  ;;  %v1408_v32 = vrot.slane %v1407_v4, 4  ;;  %v1414_v9 = vsel %vm169_vm7, %v3030_v47, 0.0 }
 0x154   :  { %v1369_v18 = vadd.f32 %v1368_v34, %v1367_v41  ;;  %v1382_v10 = vrot.slane %v1381_v46, 2  ;;  %v1389_v59 = vrot.slane %v1388_v51, 2  ;;  %v1395_v14 = vadd.f32 %v1394_v63, %v1393_v38 }
 0x155   :  { %v1376_v45 = vadd.f32 %v1375_v25, %v1374_v50  ;;  %v1402_v29 = vadd.f32 %v1401_v27, %v1400_v1  ;;  %v1409_v13 = vadd.f32 %v1408_v32, %v1407_v4  ;;  %v1415_v62 = vrot.slane %v1414_v9, 4 }
 0x156   :  { %v1370_v54 = vrot.slane %v1369_v18, 1  ;;  %v1383_v17 = vadd.f32 %v1382_v10, %v1381_v46  ;;  %v1390_v23 = vadd.f32 %v1389_v59, %v1388_v51  ;;  %v1396_v20 = vrot.slane %v1395_v14, 2 }
 0x157   :  { %v1377_v30 = vrot.slane %v1376_v45, 1  ;;  %v1403_v61 = vrot.slane %v1402_v29, 2  ;;  %v1410_v16 = vrot.slane %v1409_v13, 2  ;;  %v1416_v3 = vadd.f32 %v1415_v62, %v1414_v9 }
 0x158   :  { %v3129_v53 = vadd.f32 %v1370_v54, %v1369_v18  ;;  %v1384_v36 = vrot.slane %v1383_v17, 1  ;;  %v1391_v47 = vrot.slane %v1390_v23, 1  ;;  %v1397_v8 = vadd.f32 %v1396_v20, %v1395_v14 }
 0x159   :  { %v3131_v22 = vadd.f32 %v1377_v30, %v1376_v45  ;;  %v1404_v15 = vadd.f32 %v1403_v61, %v1402_v29  ;;  %v1411_v11 = vadd.f32 %v1410_v16, %v1409_v13  ;;  %v1417_v43 = vrot.slane %v1416_v3, 2 }
 0x15a   :  { %v3133_v60 = vadd.f32 %v1384_v36, %v1383_v17  ;;  %v3135_v40 = vadd.f32 %v1391_v47, %v1390_v23  ;;  %v1398_v5 = vrot.slane %v1397_v8, 1  ;;  %v1421_v55 = vsel %vm159_vm6, %v3041_v39, 0.0 }
 0x15b   :  { %v1405_v19 = vrot.slane %v1404_v15, 1  ;;  %v1412_v44 = vrot.slane %v1411_v11, 1  ;;  %v1418_v7 = vadd.f32 %v1417_v43, %v1416_v3  ;;  %v1422_v31 = vrot.slane %v1421_v55, 4 }
 0x15c   :  { %v3139_v56 = vadd.f32 %v1398_v5, %v1397_v8  ;;  %v1428_v12 = vsel %vm159_vm6, %v3052_v21, 0.0  ;;  %v1435_v58 = vsel %vm159_vm6, %v3063_v57, 0.0  ;;  %v1442_v26 = vsel %vm169_vm7, %v3074_v28, 0.0 }
 0x15d   :  { %v3147_v0 = vadd.f32 %v1405_v19, %v1404_v15  ;;  %v3149_v52 = vadd.f32 %v1412_v44, %v1411_v11  ;;  %v1419_v39 = vrot.slane %v1418_v7, 1  ;;  %v1423_v35 = vadd.f32 %v1422_v31, %v1421_v55 }
 0x15e   :  { %v1429_v24 = vrot.slane %v1428_v12, 4  ;;  %v1436_v37 = vrot.slane %v1435_v58, 4  ;;  %v1443_v41 = vrot.slane %v1442_v26, 4  ;;  %v1449_v2 = vsel %vm159_vm6, %v3085_v42, 0.0 }
 0x15f   :  { %v1420_v48 = vadd.f32 %v1419_v39, %v1418_v7  ;;  %v1424_v21 = vrot.slane %v1423_v35, 2  ;;  %v1450_v50 = vrot.slane %v1449_v2, 4  ;;  %v1456_v57 = vsel %vm159_vm6, %v3096_v33, 0.0 }
 0x160   :  { %v1430_v38 = vadd.f32 %v1429_v24, %v1428_v12  ;;  %v1437_v28 = vadd.f32 %v1436_v37, %v1435_v58  ;;  %v1444_v1 = vadd.f32 %v1443_v41, %v1442_v26  ;;  %v1457_v4 = vrot.slane %v1456_v57, 4 }
 0x161   :  { %v1425_v34 = vadd.f32 %v1424_v21, %v1423_v35  ;;  %v1451_v46 = vadd.f32 %v1450_v50, %v1449_v2  ;;  %v1463_v51 = vsel %vm159_vm6, %v3108_v49, 0.0  ;;  %v1470_v63 = vsel %vm169_vm7, %v3119_v6, 0.0 }
 0x162   :  { %v1431_v25 = vrot.slane %v1430_v38, 2  ;;  %v1438_v42 = vrot.slane %v1437_v28, 2  ;;  %v1445_v27 = vrot.slane %v1444_v1, 2  ;;  %v1458_v32 = vadd.f32 %v1457_v4, %v1456_v57 }
 0x163   :  { %v1426_v9 = vrot.slane %v1425_v34, 1  ;;  %v1452_v18 = vrot.slane %v1451_v46, 2  ;;  %v1464_v10 = vrot.slane %v1463_v51, 4  ;;  %v1471_v33 = vrot.slane %v1470_v63, 4 }
 0x164   :  { %v1432_v59 = vadd.f32 %v1431_v25, %v1430_v38  ;;  %v1439_v14 = vadd.f32 %v1438_v42, %v1437_v28  ;;  %v1446_v45 = vadd.f32 %v1445_v27, %v1444_v1  ;;  %v1459_v29 = vrot.slane %v1458_v32, 2 }
 0x165   :  { %v1427_v13 = vadd.f32 %v1426_v9, %v1425_v34  ;;  %v1453_v62 = vadd.f32 %v1452_v18, %v1451_v46  ;;  %v1465_v54 = vadd.f32 %v1464_v10, %v1463_v51  ;;  %v1472_v17 = vadd.f32 %v1471_v33, %v1470_v63 }
 0x166   :  { %v1433_v49 = vrot.slane %v1432_v59, 1  ;;  %v1440_v23 = vrot.slane %v1439_v14, 1  ;;  %v1447_v20 = vrot.slane %v1446_v45, 1  ;;  %v1460_v6 = vadd.f32 %v1459_v29, %v1458_v32 }
 0x167   :  { %v1454_v30 = vrot.slane %v1453_v62, 1  ;;  %v1466_v61 = vrot.slane %v1465_v54, 2  ;;  %v1473_v16 = vrot.slane %v1472_v17, 2  ;;  %v1493_v3 = vrot.slane %v3131_v22, 4 }
 0x168   :  { %v1434_v36 = vadd.f32 %v1433_v49, %v1432_v59  ;;  %v1441_v47 = vadd.f32 %v1440_v23, %v1439_v14  ;;  %v1448_v8 = vadd.f32 %v1447_v20, %v1446_v45  ;;  %v1461_v15 = vrot.slane %v1460_v6, 1 }
 0x169   :  { %v1455_v11 = vadd.f32 %v1454_v30, %v1453_v62  ;;  %v1467_v43 = vadd.f32 %v1466_v61, %v1465_v54  ;;  %v1474_v5 = vadd.f32 %v1473_v16, %v1472_v17  ;;  %v1494_v55 = vrot.slane %v3135_v40, 4 }
 0x16a   :  { %v1462_v19 = vadd.f32 %v1461_v15, %v1460_v6  ;;  %v1495_v44 = vrot.slane %v3147_v0, 4  ;;  %v1496_v7 = vrot.slane %v1420_v48, 4  ;;  %v1497_v31 = vrot.slane %v1434_v36, 4 }
 0x16b   :  { %v1468_v12 = vrot.slane %v1467_v43, 1  ;;  %v1475_v58 = vrot.slane %v1474_v5, 1  ;;  %v1498_v26 = vrot.slane %v1448_v8, 4  ;;  %v1502_v22 = vsel %vm1501_vm9, %v3129_v53, %v1493_v3 }
 0x16c   :  { %v1499_v39 = vrot.slane %v1462_v19, 4  ;;  %v1504_v35 = vsel %vm1501_vm9, %v3139_v56, %v1495_v44  ;;  %v1505_v40 = vsel %vm1501_vm9, %v3149_v52, %v1496_v7  ;;  %v1506_v0 = vsel %vm1501_vm9, %v1427_v13, %v1497_v31 }
 0x16d   :  { %v1469_v24 = vadd.f32 %v1468_v12, %v1467_v43  ;;  %v1476_v37 = vadd.f32 %v1475_v58, %v1474_v5  ;;  %v1507_v41 = vsel %vm1501_vm9, %v1441_v47, %v1498_v26  ;;  %v1510_v48 = vrot.slane %v1504_v35, 7 }
 0x16e   :  { %v1508_v2 = vsel %vm1501_vm9, %v1455_v11, %v1499_v39  ;;  %v1503_v53 = vsel %vm1501_vm9, %v3133_v60, %v1494_v55  ;;  %v1514_v50 = vrot.slane %v1506_v0, 6  ;;  %v1522_v38 = vrot.slane %v1505_v40, 7 }
 0x16f   :  { %v1500_v21 = vrot.slane %v1476_v37, 4  ;;  %v1511_v56 = vsel %vm128_vm3, %v1510_v48, %v1502_v22  ;;  %v1518_v57 = vrot.slane %v1508_v2, 5  ;;  %v1525_v28 = vrot.slane %v1507_v41, 6 }
 0x170   :  { %v1513_v1 = vsel %vm1512_vm10, %v1510_v48, %v1511_v56  ;;  %v1523_v34 = vsel %vm128_vm3, %v1522_v38, %v1503_v53 }
 0x171   :  { %v1509_v52 = vsel %vm1501_vm9, %v1469_v24, %v1500_v21  ;;  %v1515_v4 = vsel %vm124_vm1, %v1514_v50, %v1513_v1  ;;  %v1524_v51 = vsel %vm1512_vm10, %v1522_v38, %v1523_v34 }
 0x172   :  { %v1528_v46 = vrot.slane %v1509_v52, 5  ;;  %v1517_v60 = vsel %vm1516_vm11, %v1514_v50, %v1515_v4  ;;  %v1526_v25 = vsel %vm124_vm1, %v1525_v28, %v1524_v51 }
 0x173   :  { %v1519_v63 = vsel %vm130_vm4, %v1518_v57, %v1517_v60  ;;  %v1527_v27 = vsel %vm1516_vm11, %v1525_v28, %v1526_v25 }
 0x174   :  { %v1521_v42 = vsel %vm1520_vm12, %v1518_v57, %v1519_v63  ;;  %v1529_v32 = vsel %vm130_vm4, %v1528_v46, %v1527_v27 }
 0x175   :  { %1533 = vst [vmem:[%s3196_s5] sm:$0xff] %v1521_v42  ;;  %v1530_v9 = vsel %vm1520_vm12, %v1528_v46, %v1529_v32 }
 0x176   :  { %1536 = vst.msk [vmem:[%s3196_s5 + $0x8] sm:$0xff] %vm1535_vm14, %v1530_v9 }

</bundles_post_ra>
